<compile_context>
chip_gen: v6e
topology: v6e:2x2x1
jax: 0.10.0
libtpu: 0.0.40
codegen_flags: <defaults>
</compile_context>

<pallas_src>
import math

import jax
import jax.numpy as jnp
from jax.experimental import pallas as pl
from jax.experimental.pallas import tpu as pltpu


# ----------------------------------------------------------------------------- helpers
def sinusoidal_pe(max_len, d_model):
    pos = jnp.arange(max_len, dtype=jnp.float32)[:, None]
    div = jnp.exp(jnp.arange(0, d_model, 2, dtype=jnp.float32) *
                  (-math.log(10000.0) / d_model))
    pe = jnp.zeros((max_len, d_model), dtype=jnp.float32)
    pe = pe.at[:, 0::2].set(jnp.sin(pos * div))
    pe = pe.at[:, 1::2].set(jnp.cos(pos * div))
    return pe


def _layernorm(x, w, b, eps=1e-5):
    mu = jnp.mean(x, axis=-1, keepdims=True)
    xc = x - mu
    var = jnp.mean(xc * xc, axis=-1, keepdims=True)
    return xc * jax.lax.rsqrt(var + eps) * w + b


# ----------------------------------------------------------------------------- kernel
def _make_fused_kernel(*, bb, S, S_real, D, H, L, compute_dtype):
    """One grid step = one (batch block, encoder layer) pair; R = bb * S rows."""
    R = bb * S
    HD = D // H
    f32 = jnp.float32
    cdt = compute_dtype
    need_mask = S > S_real

    def kernel(x_ref, add_ref, inw_ref,
               wqkv_ref, bqkv_ref, wo_ref, bo_ref, ln1w_ref, ln1b_ref,
               w1_ref, b1_ref, w2_ref, b2_ref, ln2w_ref, ln2b_ref,
               normw_ref, normb_ref, fcw_ref, fcb_ref,
               o_ref, h_ref, ctx_ref):
        l = pl.program_id(1)

        # ---- layer 0: input projection.  CLS rows have zero mel input and pick up
        #      exactly cls_token + pe[0] from the additive table; frame rows pick up
        #      input-proj bias + pe[t]. ------------------------------------------------
        @pl.when(l == 0)
        def _():
            h_ref[...] = jnp.dot(x_ref[...], inw_ref[...],
                                 preferred_element_type=f32) + add_ref[...]

        h = h_ref[...]                                                  # (R, D) f32

        # ---- packed QKV projection (attention scale pre-folded into Wq/bq) ---------
        qkv = jnp.dot(h.astype(cdt), wqkv_ref[...],
                      preferred_element_type=f32) + bqkv_ref[...]       # (R, 3D) f32
        qkv_c = qkv.astype(cdt)

        # key-padding mask for the padded sublane rows (static, generated in-kernel)
        if need_mask:
            col = jax.lax.broadcasted_iota(jnp.int32, (1, S), 1)
            kmask = jnp.where(col < S_real, 0.0, -1e30).astype(f32)

        # ---- attention per batch element / head: (S, S) scores only ----------------
        for b in range(bb):
            r0 = b * S
            for hh in range(H):
                c0 = hh * HD
                q = qkv_c[r0:r0 + S, c0:c0 + HD]                        # (S, HD)
                k = qkv_c[r0:r0 + S, D + c0:D + c0 + HD]
                v = qkv_c[r0:r0 + S, 2 * D + c0:2 * D + c0 + HD]
                s = jnp.einsum('qe,ke->qk', q, k,
                               preferred_element_type=f32)              # (S, S)
                if need_mask:
                    s = s + kmask
                m = jnp.max(s, axis=-1, keepdims=True)
                p = jnp.exp(s - m)
                p = p * pl.reciprocal(jnp.sum(p, axis=-1, keepdims=True), approx=True)
                ctx_ref[r0:r0 + S, c0:c0 + HD] = jnp.einsum(
                    'qk,ke->qe', p.astype(cdt), v, preferred_element_type=f32)

        # ---- output projection + residual + LN1 (PyTorch post-norm, eps=1e-5) ------
        attn = jnp.dot(ctx_ref[...].astype(cdt), wo_ref[...],
                       preferred_element_type=f32) + bo_ref[...]        # (R, D)
        x1 = _layernorm(h + attn, ln1w_ref[...], ln1b_ref[...])

        # ---- ReLU FFN + residual + LN2 ----------------------------------------------
        hid = jnp.maximum(jnp.dot(x1.astype(cdt), w1_ref[...],
                                  preferred_element_type=f32) + b1_ref[...], 0.0)
        ffo = jnp.dot(hid.astype(cdt), w2_ref[...],
                      preferred_element_type=f32) + b2_ref[...]
        h_new = _layernorm(x1 + ffo, ln2w_ref[...], ln2b_ref[...])
        h_ref[...] = h_new

        # ---- final LayerNorm + classifier on the bb CLS rows (last layer only) -----
        @pl.when(l == L - 1)
        def _():
            rows = [h_new[b * S:b * S + 1, :] for b in range(bb)]
            cls = rows[0] if bb == 1 else jnp.concatenate(rows, axis=0)  # (bb, D)
            cls = _layernorm(cls, normw_ref[...], normb_ref[...])
            logits = jnp.dot(cls.astype(cdt), fcw_ref[...],
                             preferred_element_type=f32) + fcb_ref[...]
            o_ref[...] = logits.astype(o_ref.dtype)

    return kernel


# ----------------------------------------------------------------------------- params
def init_params(key, mel, d, ff, layers, ncls):
    """PyTorch-layout parameters (weights are (out_features, in_features))."""
    def dense(k, out_f, in_f):
        kw, kb = jax.random.split(k)
        w = jax.random.normal(kw, (out_f, in_f), jnp.float32) * 0.02
        b = jax.random.normal(kb, (out_f,), jnp.float32) * 0.02
        return w, b

    keys = jax.random.split(key, 3 + layers)
    params = {}
    params['in_w'], params['in_b'] = dense(keys[0], d, mel)
    params['cls'] = jax.random.normal(keys[1], (1, 1, d), jnp.float32) * 0.02
    params['fc_w'], params['fc_b'] = dense(keys[2], ncls, d)
    params['norm_w'] = jnp.ones((d,), jnp.float32)
    params['norm_b'] = jnp.zeros((d,), jnp.float32)

    layer_list = []
    for i in range(layers):
        lk = jax.random.split(keys[3 + i], 4)
        wqkv, bqkv = dense(lk[0], 3 * d, d)      # packed in_proj (PyTorch MHA layout)
        wo, bo = dense(lk[1], d, d)
        w1, b1 = dense(lk[2], ff, d)
        w2, b2 = dense(lk[3], d, ff)
        layer_list.append(dict(
            wqkv=wqkv, bqkv=bqkv, wo=wo, bo=bo,
            ln1w=jnp.ones((d,), jnp.float32), ln1b=jnp.zeros((d,), jnp.float32),
            w1=w1, b1=b1, w2=w2, b2=b2,
            ln2w=jnp.ones((d,), jnp.float32), ln2b=jnp.zeros((d,), jnp.float32)))
    params['layers'] = layer_list
    return params


def _prepare_params(params, *, nhead, dtype):
    """Re-layout PyTorch-style params for the fused kernel: pre-transposed (in, out)
    matrices, packed QKV with the 1/sqrt(head_dim) scale folded into Wq/bq, all
    per-layer tensors stacked over a leading L axis."""
    f32 = jnp.float32
    D = params['in_w'].shape[0]
    HD = D // nhead
    scale = 1.0 / math.sqrt(HD)

    in_w_t = params['in_w'].T.astype(dtype)                             # (MEL, D)

    names = ('wqkv', 'bqkv', 'wo', 'bo', 'ln1w', 'ln1b',
             'w1', 'b1', 'w2', 'b2', 'ln2w', 'ln2b')
    stacked = {n: [] for n in names}
    for lp in params['layers']:
        w = lp['wqkv'].T                                 # (D, 3D) = [Wq^T|Wk^T|Wv^T]
        b = lp['bqkv']                                   # (3D,)
        w = w.at[:, :D].multiply(scale)                  # fold attention scale
        b = b.at[:D].multiply(scale)
        stacked['wqkv'].append(w.astype(dtype))
        stacked['bqkv'].append(b.reshape(1, 3 * D).astype(f32))
        stacked['wo'].append(lp['wo'].T.astype(dtype))                  # (D, D)
        stacked['bo'].append(lp['bo'].reshape(1, D).astype(f32))
        stacked['ln1w'].append(lp['ln1w'].reshape(1, D).astype(f32))
        stacked['ln1b'].append(lp['ln1b'].reshape(1, D).astype(f32))
        stacked['w1'].append(lp['w1'].T.astype(dtype))                  # (D, FF)
        stacked['b1'].append(lp['b1'].reshape(1, -1).astype(f32))
        stacked['w2'].append(lp['w2'].T.astype(dtype))                  # (FF, D)
        stacked['b2'].append(lp['b2'].reshape(1, D).astype(f32))
        stacked['ln2w'].append(lp['ln2w'].reshape(1, D).astype(f32))
        stacked['ln2b'].append(lp['ln2b'].reshape(1, D).astype(f32))
    stacked = {k: jnp.stack(v, axis=0) for k, v in stacked.items()}

    norm_w = params['norm_w'].reshape(1, D).astype(f32)
    norm_b = params['norm_b'].reshape(1, D).astype(f32)
    fc_w_t = params['fc_w'].T.astype(dtype)                             # (D, NCLS)
    fc_b = params['fc_b'].reshape(1, -1).astype(f32)
    return in_w_t, stacked, norm_w, norm_b, fc_w_t, fc_b


# ----------------------------------------------------------------------------- forward
def chord_transformer_forward(x, params, *, nhead, dtype=jnp.float32,
                              batch_block=None, lengths=None):
    """Fused forward of ChordTransformer (inference; dropout = identity).

    grid = (B // batch_block, num_layers); pick batch_block = B // 2 on v7x so the
    "parallel" batch axis has >= 2 steps (both TensorCores).
    """
    assert lengths is None  # TODO(synk): key-padding mask path not implemented
    B, T, MEL = x.shape
    D = params['in_w'].shape[0]
    FF = params['layers'][0]['w1'].shape[0]
    NCLS = params['fc_w'].shape[0]
    L = len(params['layers'])
    H = nhead
    assert D % H == 0

    bb = B if batch_block is None else batch_block
    assert B % bb == 0
    n_blocks = B // bb

    S_real = T + 1
    sub = 8 if dtype == jnp.float32 else 16
    S = ((S_real + sub - 1) // sub) * sub          # sublane-aligned sequence length
    R = bb * S
    f32 = jnp.float32

    in_w_t, lw, norm_w, norm_b, fc_w_t, fc_b = _prepare_params(
        params, nhead=nhead, dtype=dtype)

    # Additive table fusing CLS token + positional encoding + input-proj bias:
    #   CLS rows (zero mel input) -> cls_token + pe[0];  frame rows -> in_b + pe[t]
    pe = sinusoidal_pe(S, D)
    add_tbl = jnp.concatenate(
        [params['cls'].reshape(1, D).astype(f32) + pe[0:1],
         params['in_b'].reshape(1, D).astype(f32) + pe[1:S]], axis=0)   # (S, D)
    add_tiled = jnp.tile(add_tbl, (bb, 1))                              # (R, D)

    # mel input: zero CLS row prepended, zero pad rows appended, flattened to rows
    x_aug = jnp.concatenate(
        [jnp.zeros((B, 1, MEL), x.dtype), x,
         jnp.zeros((B, S - S_real, MEL), x.dtype)], axis=1)             # (B, S, MEL)
    x_flat = x_aug.reshape(B * S, MEL).astype(dtype)

    const_inputs = [add_tiled, in_w_t]
    layer_inputs = [lw['wqkv'], lw['bqkv'], lw['wo'], lw['bo'],
                    lw['ln1w'], lw['ln1b'], lw['w1'], lw['b1'],
                    lw['w2'], lw['b2'], lw['ln2w'], lw['ln2b']]
    final_inputs = [norm_w, norm_b, fc_w_t, fc_b]

    def _const_spec(a):
        nd = a.ndim
        return pl.BlockSpec(a.shape, lambda i, l, _nd=nd: (0,) * _nd)

    def _layer_spec(a):
        return pl.BlockSpec((None,) + a.shape[1:], lambda i, l: (l, 0, 0))

    in_specs = ([pl.BlockSpec((R, MEL), lambda i, l: (i, 0))]
                + [_const_spec(a) for a in const_inputs]
                + [_layer_spec(a) for a in layer_inputs]
                + [_const_spec(a) for a in final_inputs])
    out_spec = pl.BlockSpec((None, bb, NCLS), lambda i, l: (i, 0, 0))

    kernel = _make_fused_kernel(bb=bb, S=S, S_real=S_real, D=D, H=H, L=L,
                                compute_dtype=dtype)

    # VMEM budget derived from the actual per-step footprint (~2 layers of weights
    # double-buffered + constants + activations), capped at 56 MiB for v7x (64 MiB
    # physical VMEM per TC); v5e/v6e have 128 MiB so this is always safe.
    def _nb(a):
        return a.size * a.dtype.itemsize
    per_layer_w = sum(_nb(a) for a in layer_inputs) // L
    const_b = (sum(_nb(a) for a in const_inputs + final_inputs)
               + _nb(x_flat) // n_blocks)
    act_b = 4 * (2 * R * D        # h + ctx scratch
                 + 3 * R * D      # qkv
                 + R * FF         # ffn hidden
                 + 4 * R * D      # residuals / temporaries
                 + 2 * S * S)     # per-(batch, head) scores
    est = 2 * (per_layer_w + const_b) + act_b
    vmem_limit = int(min(56 * 2 ** 20, max(32 * 2 ** 20, 2 * est)))

    out = pl.pallas_call(
        kernel,
        grid_spec=pltpu.PrefetchScalarGridSpec(
            num_scalar_prefetch=0,
            grid=(n_blocks, L),
            in_specs=in_specs,
            out_specs=out_spec,
            scratch_shapes=[pltpu.VMEM((R, D), f32),    # running activation h
                            pltpu.VMEM((R, D), f32)],   # head-concatenated context
        ),
        out_shape=jax.ShapeDtypeStruct((n_blocks, bb, NCLS), f32),
        compiler_params=pltpu.CompilerParams(
            dimension_semantics=("parallel", "arbitrary"),
            vmem_limit_bytes=vmem_limit),
    )(x_flat, *const_inputs, *layer_inputs, *final_inputs)
    return out.reshape(B, NCLS)


# --------------------------------------------------------------------------- reference
def reference_forward(x, params, *, nhead):
    """Pure-JAX mirror of the PyTorch module (inference; dropout = identity)."""
    B, T, MEL = x.shape
    D = params['in_w'].shape[0]
    H = nhead
    HD = D // H
    S = T + 1
    h = jnp.einsum('btm,dm->btd', x, params['in_w']) + params['in_b']
    cls = jnp.broadcast_to(params['cls'].reshape(1, 1, D), (B, 1, D))
    h = jnp.concatenate([cls, h], axis=1) + sinusoidal_pe(S, D)[None]
    for lp in params['layers']:
        qkv = jnp.einsum('bsd,ed->bse', h, lp['wqkv']) + lp['bqkv']
        q, k, v = qkv[..., :D], qkv[..., D:2 * D], qkv[..., 2 * D:]
        q = q.reshape(B, S, H, HD).transpose(0, 2, 1, 3) / math.sqrt(HD)
        k = k.reshape(B, S, H, HD).transpose(0, 2, 1, 3)
        v = v.reshape(B, S, H, HD).transpose(0, 2, 1, 3)
        p = jax.nn.softmax(jnp.einsum('bhqe,bhke->bhqk', q, k), axis=-1)
        ctx = jnp.einsum('bhqk,bhke->bhqe', p, v).transpose(0, 2, 1, 3).reshape(B, S, D)
        attn = jnp.einsum('bsd,ed->bse', ctx, lp['wo']) + lp['bo']
        x1 = _layernorm(h + attn, lp['ln1w'], lp['ln1b'])
        hid = jax.nn.relu(jnp.einsum('bsd,fd->bsf', x1, lp['w1']) + lp['b1'])
        ffo = jnp.einsum('bsf,df->bsd', hid, lp['w2']) + lp['b2']
        h = _layernorm(x1 + ffo, lp['ln2w'], lp['ln2b'])
    out = _layernorm(h[:, 0], params['norm_w'], params['norm_b'])
    return jnp.einsum('bd,cd->bc', out, params['fc_w']) + params['fc_b']


# ----------------------------------------------------------------------------- main
if __name__ == "__main__":
    key = jax.random.PRNGKey(0)
    kx, kp = jax.random.split(key)

    # small shapes consistent with the module's (B, T, mel_bins) input
    B, T = 2, 8
    MEL, D, H, FF, LAYERS, NCLS = 16, 32, 4, 64, 2, 20

    x = jax.random.normal(kx, (B, T, MEL), jnp.float32)
    params = init_params(kp, MEL, D, FF, LAYERS, NCLS)

    ref = reference_forward(x, params, nhead=H)

    # f32 path, single batch block (default; best for single-TC v5e/v6e)
    out = jax.block_until_ready(chord_transformer_forward(x, params, nhead=H))
    assert out.shape == (B, NCLS)
    assert bool(jnp.all(jnp.isfinite(out)))
    assert bool(jnp.max(jnp.abs(out - ref)) < 2e-2)

    # f32 path, two batch blocks (>= 2 "parallel" grid steps -> both TCs on v7x)
    out2 = jax.block_until_ready(
        chord_transformer_forward(x, params, nhead=H, batch_block=1))
    assert out2.shape == (B, NCLS)
    assert bool(jnp.max(jnp.abs(out2 - ref)) < 2e-2)

    # bf16 compute path (v6e/v7x MXU), f32 accumulation / LayerNorm / softmax
    out_bf16 = jax.block_until_ready(
        chord_transformer_forward(x, params, nhead=H, dtype=jnp.bfloat16))
    assert out_bf16.shape == (B, NCLS)
    assert bool(jnp.all(jnp.isfinite(out_bf16)))
    assert bool(jnp.max(jnp.abs(out_bf16 - ref)) < 5e-2)

    print("KERNEL_OK")
</pallas_src>

<mosaic_0001>
module attributes {stable_mosaic.version = 11 : i64} {
  func.func @kernel(%arg0: i32, %arg1: i32, %arg2: memref<32x16xf32, #tpu.memory_space<vmem>>, %arg3: memref<32x32xf32, #tpu.memory_space<vmem>>, %arg4: memref<16x32xf32, #tpu.memory_space<vmem>>, %arg5: memref<1x32x96xf32, #tpu.memory_space<vmem>>, %arg6: memref<1x1x96xf32, #tpu.memory_space<vmem>>, %arg7: memref<1x32x32xf32, #tpu.memory_space<vmem>>, %arg8: memref<1x1x32xf32, #tpu.memory_space<vmem>>, %arg9: memref<1x1x32xf32, #tpu.memory_space<vmem>>, %arg10: memref<1x1x32xf32, #tpu.memory_space<vmem>>, %arg11: memref<1x32x64xf32, #tpu.memory_space<vmem>>, %arg12: memref<1x1x64xf32, #tpu.memory_space<vmem>>, %arg13: memref<1x64x32xf32, #tpu.memory_space<vmem>>, %arg14: memref<1x1x32xf32, #tpu.memory_space<vmem>>, %arg15: memref<1x1x32xf32, #tpu.memory_space<vmem>>, %arg16: memref<1x1x32xf32, #tpu.memory_space<vmem>>, %arg17: memref<1x32xf32, #tpu.memory_space<vmem>>, %arg18: memref<1x32xf32, #tpu.memory_space<vmem>>, %arg19: memref<32x20xf32, #tpu.memory_space<vmem>>, %arg20: memref<1x20xf32, #tpu.memory_space<vmem>>, %arg21: memref<1x2x20xf32, #tpu.memory_space<vmem>>, %arg22: memref<32x32xf32, #tpu.memory_space<vmem>>, %arg23: memref<32x32xf32, #tpu.memory_space<vmem>>) attributes {dimension_semantics = [#tpu.dimension_semantics<parallel>, #tpu.dimension_semantics<arbitrary>], iteration_bounds = array<i64: 1, 2>, scalar_prefetch = 0 : i64, scratch_operands = 2 : i64, tpu.core_type = #tpu.core_type<tc>, window_params = [{transform_indices = @transform_0, window_bounds = array<i64: 32, 16>}, {pipeline_mode = #tpu.pipeline_mode<synchronous>, transform_indices = @transform_1, window_bounds = array<i64: 32, 32>}, {pipeline_mode = #tpu.pipeline_mode<synchronous>, transform_indices = @transform_2, window_bounds = array<i64: 16, 32>}, {transform_indices = @transform_3, window_bounds = array<i64: 1, 32, 96>}, {transform_indices = @transform_4, window_bounds = array<i64: 1, 1, 96>}, {transform_indices = @transform_5, window_bounds = array<i64: 1, 32, 32>}, {transform_indices = @transform_6, window_bounds = array<i64: 1, 1, 32>}, {transform_indices = @transform_7, window_bounds = array<i64: 1, 1, 32>}, {transform_indices = @transform_8, window_bounds = array<i64: 1, 1, 32>}, {transform_indices = @transform_9, window_bounds = array<i64: 1, 32, 64>}, {transform_indices = @transform_10, window_bounds = array<i64: 1, 1, 64>}, {transform_indices = @transform_11, window_bounds = array<i64: 1, 64, 32>}, {transform_indices = @transform_12, window_bounds = array<i64: 1, 1, 32>}, {transform_indices = @transform_13, window_bounds = array<i64: 1, 1, 32>}, {transform_indices = @transform_14, window_bounds = array<i64: 1, 1, 32>}, {pipeline_mode = #tpu.pipeline_mode<synchronous>, transform_indices = @transform_15, window_bounds = array<i64: 1, 32>}, {pipeline_mode = #tpu.pipeline_mode<synchronous>, transform_indices = @transform_16, window_bounds = array<i64: 1, 32>}, {pipeline_mode = #tpu.pipeline_mode<synchronous>, transform_indices = @transform_17, window_bounds = array<i64: 32, 20>}, {pipeline_mode = #tpu.pipeline_mode<synchronous>, transform_indices = @transform_18, window_bounds = array<i64: 1, 20>}, {transform_indices = @transform_19, window_bounds = array<i64: 1, 2, 20>}]} {
    %c0_i32 = arith.constant 0 : i32
    %0 = arith.cmpi eq, %arg1, %c0_i32 : i32
    %1 = arith.extui %0 : i1 to i32
    %c0_i32_0 = arith.constant 0 : i32
    %2 = arith.cmpi ne, %1, %c0_i32_0 : i32
    scf.if %2 {
      %c0_104 = arith.constant 0 : index
      %c0_105 = arith.constant 0 : index
      %239 = vector.load %arg2[%c0_104, %c0_105] : memref<32x16xf32, #tpu.memory_space<vmem>>, vector<32x16xf32>
      %c0_106 = arith.constant 0 : index
      %c0_107 = arith.constant 0 : index
      %240 = vector.load %arg4[%c0_106, %c0_107] : memref<16x32xf32, #tpu.memory_space<vmem>>, vector<16x32xf32>
      %cst_108 = arith.constant dense<0.000000e+00> : vector<32x32xf32>
      %241 = tpu.matmul %239, %240, %cst_108 {dimension_numbers = #tpu.dot_dimension_numbers<[1], [0], [0], [1], [0, 0, 1, 1], [], []>} : vector<32x16xf32>, vector<16x32xf32>, vector<32x32xf32> -> vector<32x32xf32>
      %c0_109 = arith.constant 0 : index
      %c0_110 = arith.constant 0 : index
      %242 = vector.load %arg3[%c0_109, %c0_110] : memref<32x32xf32, #tpu.memory_space<vmem>>, vector<32x32xf32>
      %243 = arith.addf %241, %242 : vector<32x32xf32>
      %c0_111 = arith.constant 0 : index
      %c0_112 = arith.constant 0 : index
      %244 = vector.load %arg22[%c0_111, %c0_112] : memref<32x32xf32, #tpu.memory_space<vmem>>, vector<32x32xf32>
      tpu.vector_store %arg22[%c0_111, %c0_112], %243 {strides = array<i32>} : memref<32x32xf32, #tpu.memory_space<vmem>>, vector<32x32xf32>,
    } else {
    }
    %c0 = arith.constant 0 : index
    %c0_1 = arith.constant 0 : index
    %3 = vector.load %arg22[%c0, %c0_1] : memref<32x32xf32, #tpu.memory_space<vmem>>, vector<32x32xf32>
    %c0_2 = arith.constant 0 : index
    %c0_3 = arith.constant 0 : index
    %c0_4 = arith.constant 0 : index
    %4 = vector.load %arg5[%c0_2, %c0_3, %c0_4] : memref<1x32x96xf32, #tpu.memory_space<vmem>>, vector<1x32x96xf32>
    %5 = vector.shape_cast %4 : vector<1x32x96xf32> to vector<32x96xf32>
    %cst = arith.constant dense<0.000000e+00> : vector<32x96xf32>
    %6 = tpu.matmul %3, %5, %cst {dimension_numbers = #tpu.dot_dimension_numbers<[1], [0], [0], [1], [0, 0, 1, 1], [], []>} : vector<32x32xf32>, vector<32x96xf32>, vector<32x96xf32> -> vector<32x96xf32>
    %c0_5 = arith.constant 0 : index
    %c0_6 = arith.constant 0 : index
    %c0_7 = arith.constant 0 : index
    %7 = vector.load %arg6[%c0_5, %c0_6, %c0_7] : memref<1x1x96xf32, #tpu.memory_space<vmem>>, vector<1x1x96xf32>
    %8 = vector.shape_cast %7 : vector<1x1x96xf32> to vector<1x96xf32>
    %9 = vector.broadcast %8 : vector<1x96xf32> to vector<32x96xf32>
    %10 = arith.addf %6, %9 : vector<32x96xf32>
    %11 = tpu.iota {dimensions = array<i32: 1>} : vector<1x16xi32>
    %c9_i32 = arith.constant 9 : i32
    %12 = vector.broadcast %c9_i32 : i32 to vector<1x16xi32>
    %13 = arith.cmpi slt, %11, %12 : vector<1x16xi32>
    %cst_8 = arith.constant 0.000000e+00 : f32
    %cst_9 = arith.constant -1.000000e+30 : f32
    %14 = vector.broadcast %cst_8 : f32 to vector<1x16xf32>
    %15 = vector.broadcast %cst_9 : f32 to vector<1x16xf32>
    %16 = arith.select %13, %14, %15 : vector<1x16xi1>, vector<1x16xf32>
    %17 = vector.extract_strided_slice %10 {offsets = [0, 0], sizes = [16, 8], strides = [1, 1]} : vector<32x96xf32> to vector<16x8xf32>
    %18 = vector.extract_strided_slice %10 {offsets = [0, 32], sizes = [16, 8], strides = [1, 1]} : vector<32x96xf32> to vector<16x8xf32>
    %19 = vector.extract_strided_slice %10 {offsets = [0, 64], sizes = [16, 8], strides = [1, 1]} : vector<32x96xf32> to vector<16x8xf32>
    "tpu.trace_start"() <{level = 10 : i32, message = "qe,ke->qk"}> : () -> ()
    %cst_10 = arith.constant dense<0.000000e+00> : vector<16x16xf32>
    %20 = tpu.matmul %17, %18, %cst_10 {dimension_numbers = #tpu.dot_dimension_numbers<[1], [1], [0], [0], [0, 0, 1, 0], [], []>} : vector<16x8xf32>, vector<16x8xf32>, vector<16x16xf32> -> vector<16x16xf32>
    "tpu.trace_stop"() : () -> ()
    %21 = vector.broadcast %16 : vector<1x16xf32> to vector<16x16xf32>
    %22 = arith.addf %20, %21 : vector<16x16xf32>
    %cst_11 = arith.constant dense<0xFF800000> : vector<16xf32>
    %23 = vector.multi_reduction <maximumf>, %22, %cst_11 [1] : vector<16x16xf32> to vector<16xf32>
    %24 = vector.shape_cast %23 : vector<16xf32> to vector<16x1xf32>
    %25 = vector.broadcast %24 : vector<16x1xf32> to vector<16x16xf32>
    %26 = arith.subf %22, %25 : vector<16x16xf32>
    %27 = math.exp %26 : vector<16x16xf32>
    %cst_12 = arith.constant dense<0.000000e+00> : vector<16xf32>
    %28 = vector.multi_reduction <add>, %27, %cst_12 [1] : vector<16x16xf32> to vector<16xf32>
    %29 = vector.shape_cast %28 : vector<16xf32> to vector<16x1xf32>
    %30 = tpu.reciprocal %29 {approx = true} : vector<16x1xf32> -> vector<16x1xf32>
    %31 = vector.broadcast %30 : vector<16x1xf32> to vector<16x16xf32>
    %32 = arith.mulf %27, %31 : vector<16x16xf32>
    "tpu.trace_start"() <{level = 10 : i32, message = "qk,ke->qe"}> : () -> ()
    %cst_13 = arith.constant dense<0.000000e+00> : vector<16x8xf32>
    %33 = tpu.matmul %32, %19, %cst_13 {dimension_numbers = #tpu.dot_dimension_numbers<[1], [0], [0], [1], [0, 0, 1, 1], [], []>} : vector<16x16xf32>, vector<16x8xf32>, vector<16x8xf32> -> vector<16x8xf32>
    "tpu.trace_stop"() : () -> ()
    %c0_14 = arith.constant 0 : index
    %c0_15 = arith.constant 0 : index
    %34 = vector.load %arg23[%c0_14, %c0_15] : memref<32x32xf32, #tpu.memory_space<vmem>>, vector<16x8xf32>
    tpu.vector_store %arg23[%c0_14, %c0_15], %33 {strides = array<i32>} : memref<32x32xf32, #tpu.memory_space<vmem>>, vector<16x8xf32>,
    %35 = vector.extract_strided_slice %10 {offsets = [0, 8], sizes = [16, 8], strides = [1, 1]} : vector<32x96xf32> to vector<16x8xf32>
    %36 = vector.extract_strided_slice %10 {offsets = [0, 40], sizes = [16, 8], strides = [1, 1]} : vector<32x96xf32> to vector<16x8xf32>
    %37 = vector.extract_strided_slice %10 {offsets = [0, 72], sizes = [16, 8], strides = [1, 1]} : vector<32x96xf32> to vector<16x8xf32>
    "tpu.trace_start"() <{level = 10 : i32, message = "qe,ke->qk"}> : () -> ()
    %cst_16 = arith.constant dense<0.000000e+00> : vector<16x16xf32>
    %38 = tpu.matmul %35, %36, %cst_16 {dimension_numbers = #tpu.dot_dimension_numbers<[1], [1], [0], [0], [0, 0, 1, 0], [], []>} : vector<16x8xf32>, vector<16x8xf32>, vector<16x16xf32> -> vector<16x16xf32>
    "tpu.trace_stop"() : () -> ()
    %39 = vector.broadcast %16 : vector<1x16xf32> to vector<16x16xf32>
    %40 = arith.addf %38, %39 : vector<16x16xf32>
    %cst_17 = arith.constant dense<0xFF800000> : vector<16xf32>
    %41 = vector.multi_reduction <maximumf>, %40, %cst_17 [1] : vector<16x16xf32> to vector<16xf32>
    %42 = vector.shape_cast %41 : vector<16xf32> to vector<16x1xf32>
    %43 = vector.broadcast %42 : vector<16x1xf32> to vector<16x16xf32>
    %44 = arith.subf %40, %43 : vector<16x16xf32>
    %45 = math.exp %44 : vector<16x16xf32>
    %cst_18 = arith.constant dense<0.000000e+00> : vector<16xf32>
    %46 = vector.multi_reduction <add>, %45, %cst_18 [1] : vector<16x16xf32> to vector<16xf32>
    %47 = vector.shape_cast %46 : vector<16xf32> to vector<16x1xf32>
    %48 = tpu.reciprocal %47 {approx = true} : vector<16x1xf32> -> vector<16x1xf32>
    %49 = vector.broadcast %48 : vector<16x1xf32> to vector<16x16xf32>
    %50 = arith.mulf %45, %49 : vector<16x16xf32>
    "tpu.trace_start"() <{level = 10 : i32, message = "qk,ke->qe"}> : () -> ()
    %cst_19 = arith.constant dense<0.000000e+00> : vector<16x8xf32>
    %51 = tpu.matmul %50, %37, %cst_19 {dimension_numbers = #tpu.dot_dimension_numbers<[1], [0], [0], [1], [0, 0, 1, 1], [], []>} : vector<16x16xf32>, vector<16x8xf32>, vector<16x8xf32> -> vector<16x8xf32>
    "tpu.trace_stop"() : () -> ()
    %c0_20 = arith.constant 0 : index
    %c8 = arith.constant 8 : index
    %52 = vector.load %arg23[%c0_20, %c8] : memref<32x32xf32, #tpu.memory_space<vmem>>, vector<16x8xf32>
    tpu.vector_store %arg23[%c0_20, %c8], %51 {strides = array<i32>} : memref<32x32xf32, #tpu.memory_space<vmem>>, vector<16x8xf32>,
    %53 = vector.extract_strided_slice %10 {offsets = [0, 16], sizes = [16, 8], strides = [1, 1]} : vector<32x96xf32> to vector<16x8xf32>
    %54 = vector.extract_strided_slice %10 {offsets = [0, 48], sizes = [16, 8], strides = [1, 1]} : vector<32x96xf32> to vector<16x8xf32>
    %55 = vector.extract_strided_slice %10 {offsets = [0, 80], sizes = [16, 8], strides = [1, 1]} : vector<32x96xf32> to vector<16x8xf32>
    "tpu.trace_start"() <{level = 10 : i32, message = "qe,ke->qk"}> : () -> ()
    %cst_21 = arith.constant dense<0.000000e+00> : vector<16x16xf32>
    %56 = tpu.matmul %53, %54, %cst_21 {dimension_numbers = #tpu.dot_dimension_numbers<[1], [1], [0], [0], [0, 0, 1, 0], [], []>} : vector<16x8xf32>, vector<16x8xf32>, vector<16x16xf32> -> vector<16x16xf32>
    "tpu.trace_stop"() : () -> ()
    %57 = vector.broadcast %16 : vector<1x16xf32> to vector<16x16xf32>
    %58 = arith.addf %56, %57 : vector<16x16xf32>
    %cst_22 = arith.constant dense<0xFF800000> : vector<16xf32>
    %59 = vector.multi_reduction <maximumf>, %58, %cst_22 [1] : vector<16x16xf32> to vector<16xf32>
    %60 = vector.shape_cast %59 : vector<16xf32> to vector<16x1xf32>
    %61 = vector.broadcast %60 : vector<16x1xf32> to vector<16x16xf32>
    %62 = arith.subf %58, %61 : vector<16x16xf32>
    %63 = math.exp %62 : vector<16x16xf32>
    %cst_23 = arith.constant dense<0.000000e+00> : vector<16xf32>
    %64 = vector.multi_reduction <add>, %63, %cst_23 [1] : vector<16x16xf32> to vector<16xf32>
    %65 = vector.shape_cast %64 : vector<16xf32> to vector<16x1xf32>
    %66 = tpu.reciprocal %65 {approx = true} : vector<16x1xf32> -> vector<16x1xf32>
    %67 = vector.broadcast %66 : vector<16x1xf32> to vector<16x16xf32>
    %68 = arith.mulf %63, %67 : vector<16x16xf32>
    "tpu.trace_start"() <{level = 10 : i32, message = "qk,ke->qe"}> : () -> ()
    %cst_24 = arith.constant dense<0.000000e+00> : vector<16x8xf32>
    %69 = tpu.matmul %68, %55, %cst_24 {dimension_numbers = #tpu.dot_dimension_numbers<[1], [0], [0], [1], [0, 0, 1, 1], [], []>} : vector<16x16xf32>, vector<16x8xf32>, vector<16x8xf32> -> vector<16x8xf32>
    "tpu.trace_stop"() : () -> ()
    %c0_25 = arith.constant 0 : index
    %c16 = arith.constant 16 : index
    %70 = vector.load %arg23[%c0_25, %c16] : memref<32x32xf32, #tpu.memory_space<vmem>>, vector<16x8xf32>
    tpu.vector_store %arg23[%c0_25, %c16], %69 {strides = array<i32>} : memref<32x32xf32, #tpu.memory_space<vmem>>, vector<16x8xf32>,
    %71 = vector.extract_strided_slice %10 {offsets = [0, 24], sizes = [16, 8], strides = [1, 1]} : vector<32x96xf32> to vector<16x8xf32>
    %72 = vector.extract_strided_slice %10 {offsets = [0, 56], sizes = [16, 8], strides = [1, 1]} : vector<32x96xf32> to vector<16x8xf32>
    %73 = vector.extract_strided_slice %10 {offsets = [0, 88], sizes = [16, 8], strides = [1, 1]} : vector<32x96xf32> to vector<16x8xf32>
    "tpu.trace_start"() <{level = 10 : i32, message = "qe,ke->qk"}> : () -> ()
    %cst_26 = arith.constant dense<0.000000e+00> : vector<16x16xf32>
    %74 = tpu.matmul %71, %72, %cst_26 {dimension_numbers = #tpu.dot_dimension_numbers<[1], [1], [0], [0], [0, 0, 1, 0], [], []>} : vector<16x8xf32>, vector<16x8xf32>, vector<16x16xf32> -> vector<16x16xf32>
    "tpu.trace_stop"() : () -> ()
    %75 = vector.broadcast %16 : vector<1x16xf32> to vector<16x16xf32>
    %76 = arith.addf %74, %75 : vector<16x16xf32>
    %cst_27 = arith.constant dense<0xFF800000> : vector<16xf32>
    %77 = vector.multi_reduction <maximumf>, %76, %cst_27 [1] : vector<16x16xf32> to vector<16xf32>
    %78 = vector.shape_cast %77 : vector<16xf32> to vector<16x1xf32>
    %79 = vector.broadcast %78 : vector<16x1xf32> to vector<16x16xf32>
    %80 = arith.subf %76, %79 : vector<16x16xf32>
    %81 = math.exp %80 : vector<16x16xf32>
    %cst_28 = arith.constant dense<0.000000e+00> : vector<16xf32>
    %82 = vector.multi_reduction <add>, %81, %cst_28 [1] : vector<16x16xf32> to vector<16xf32>
    %83 = vector.shape_cast %82 : vector<16xf32> to vector<16x1xf32>
    %84 = tpu.reciprocal %83 {approx = true} : vector<16x1xf32> -> vector<16x1xf32>
    %85 = vector.broadcast %84 : vector<16x1xf32> to vector<16x16xf32>
    %86 = arith.mulf %81, %85 : vector<16x16xf32>
    "tpu.trace_start"() <{level = 10 : i32, message = "qk,ke->qe"}> : () -> ()
    %cst_29 = arith.constant dense<0.000000e+00> : vector<16x8xf32>
    %87 = tpu.matmul %86, %73, %cst_29 {dimension_numbers = #tpu.dot_dimension_numbers<[1], [0], [0], [1], [0, 0, 1, 1], [], []>} : vector<16x16xf32>, vector<16x8xf32>, vector<16x8xf32> -> vector<16x8xf32>
    "tpu.trace_stop"() : () -> ()
    %c0_30 = arith.constant 0 : index
    %c24 = arith.constant 24 : index
    %88 = vector.load %arg23[%c0_30, %c24] : memref<32x32xf32, #tpu.memory_space<vmem>>, vector<16x8xf32>
    tpu.vector_store %arg23[%c0_30, %c24], %87 {strides = array<i32>} : memref<32x32xf32, #tpu.memory_space<vmem>>, vector<16x8xf32>,
    %89 = vector.extract_strided_slice %10 {offsets = [16, 0], sizes = [16, 8], strides = [1, 1]} : vector<32x96xf32> to vector<16x8xf32>
    %90 = vector.extract_strided_slice %10 {offsets = [16, 32], sizes = [16, 8], strides = [1, 1]} : vector<32x96xf32> to vector<16x8xf32>
    %91 = vector.extract_strided_slice %10 {offsets = [16, 64], sizes = [16, 8], strides = [1, 1]} : vector<32x96xf32> to vector<16x8xf32>
    "tpu.trace_start"() <{level = 10 : i32, message = "qe,ke->qk"}> : () -> ()
    %cst_31 = arith.constant dense<0.000000e+00> : vector<16x16xf32>
    %92 = tpu.matmul %89, %90, %cst_31 {dimension_numbers = #tpu.dot_dimension_numbers<[1], [1], [0], [0], [0, 0, 1, 0], [], []>} : vector<16x8xf32>, vector<16x8xf32>, vector<16x16xf32> -> vector<16x16xf32>
    "tpu.trace_stop"() : () -> ()
    %93 = vector.broadcast %16 : vector<1x16xf32> to vector<16x16xf32>
    %94 = arith.addf %92, %93 : vector<16x16xf32>
    %cst_32 = arith.constant dense<0xFF800000> : vector<16xf32>
    %95 = vector.multi_reduction <maximumf>, %94, %cst_32 [1] : vector<16x16xf32> to vector<16xf32>
    %96 = vector.shape_cast %95 : vector<16xf32> to vector<16x1xf32>
    %97 = vector.broadcast %96 : vector<16x1xf32> to vector<16x16xf32>
    %98 = arith.subf %94, %97 : vector<16x16xf32>
    %99 = math.exp %98 : vector<16x16xf32>
    %cst_33 = arith.constant dense<0.000000e+00> : vector<16xf32>
    %100 = vector.multi_reduction <add>, %99, %cst_33 [1] : vector<16x16xf32> to vector<16xf32>
    %101 = vector.shape_cast %100 : vector<16xf32> to vector<16x1xf32>
    %102 = tpu.reciprocal %101 {approx = true} : vector<16x1xf32> -> vector<16x1xf32>
    %103 = vector.broadcast %102 : vector<16x1xf32> to vector<16x16xf32>
    %104 = arith.mulf %99, %103 : vector<16x16xf32>
    "tpu.trace_start"() <{level = 10 : i32, message = "qk,ke->qe"}> : () -> ()
    %cst_34 = arith.constant dense<0.000000e+00> : vector<16x8xf32>
    %105 = tpu.matmul %104, %91, %cst_34 {dimension_numbers = #tpu.dot_dimension_numbers<[1], [0], [0], [1], [0, 0, 1, 1], [], []>} : vector<16x16xf32>, vector<16x8xf32>, vector<16x8xf32> -> vector<16x8xf32>
    "tpu.trace_stop"() : () -> ()
    %c16_35 = arith.constant 16 : index
    %c0_36 = arith.constant 0 : index
    %106 = vector.load %arg23[%c16_35, %c0_36] : memref<32x32xf32, #tpu.memory_space<vmem>>, vector<16x8xf32>
    tpu.vector_store %arg23[%c16_35, %c0_36], %105 {strides = array<i32>} : memref<32x32xf32, #tpu.memory_space<vmem>>, vector<16x8xf32>,
    %107 = vector.extract_strided_slice %10 {offsets = [16, 8], sizes = [16, 8], strides = [1, 1]} : vector<32x96xf32> to vector<16x8xf32>
    %108 = vector.extract_strided_slice %10 {offsets = [16, 40], sizes = [16, 8], strides = [1, 1]} : vector<32x96xf32> to vector<16x8xf32>
    %109 = vector.extract_strided_slice %10 {offsets = [16, 72], sizes = [16, 8], strides = [1, 1]} : vector<32x96xf32> to vector<16x8xf32>
    "tpu.trace_start"() <{level = 10 : i32, message = "qe,ke->qk"}> : () -> ()
    %cst_37 = arith.constant dense<0.000000e+00> : vector<16x16xf32>
    %110 = tpu.matmul %107, %108, %cst_37 {dimension_numbers = #tpu.dot_dimension_numbers<[1], [1], [0], [0], [0, 0, 1, 0], [], []>} : vector<16x8xf32>, vector<16x8xf32>, vector<16x16xf32> -> vector<16x16xf32>
    "tpu.trace_stop"() : () -> ()
    %111 = vector.broadcast %16 : vector<1x16xf32> to vector<16x16xf32>
    %112 = arith.addf %110, %111 : vector<16x16xf32>
    %cst_38 = arith.constant dense<0xFF800000> : vector<16xf32>
    %113 = vector.multi_reduction <maximumf>, %112, %cst_38 [1] : vector<16x16xf32> to vector<16xf32>
    %114 = vector.shape_cast %113 : vector<16xf32> to vector<16x1xf32>
    %115 = vector.broadcast %114 : vector<16x1xf32> to vector<16x16xf32>
    %116 = arith.subf %112, %115 : vector<16x16xf32>
    %117 = math.exp %116 : vector<16x16xf32>
    %cst_39 = arith.constant dense<0.000000e+00> : vector<16xf32>
    %118 = vector.multi_reduction <add>, %117, %cst_39 [1] : vector<16x16xf32> to vector<16xf32>
    %119 = vector.shape_cast %118 : vector<16xf32> to vector<16x1xf32>
    %120 = tpu.reciprocal %119 {approx = true} : vector<16x1xf32> -> vector<16x1xf32>
    %121 = vector.broadcast %120 : vector<16x1xf32> to vector<16x16xf32>
    %122 = arith.mulf %117, %121 : vector<16x16xf32>
    "tpu.trace_start"() <{level = 10 : i32, message = "qk,ke->qe"}> : () -> ()
    %cst_40 = arith.constant dense<0.000000e+00> : vector<16x8xf32>
    %123 = tpu.matmul %122, %109, %cst_40 {dimension_numbers = #tpu.dot_dimension_numbers<[1], [0], [0], [1], [0, 0, 1, 1], [], []>} : vector<16x16xf32>, vector<16x8xf32>, vector<16x8xf32> -> vector<16x8xf32>
    "tpu.trace_stop"() : () -> ()
    %c16_41 = arith.constant 16 : index
    %c8_42 = arith.constant 8 : index
    %124 = vector.load %arg23[%c16_41, %c8_42] : memref<32x32xf32, #tpu.memory_space<vmem>>, vector<16x8xf32>
    tpu.vector_store %arg23[%c16_41, %c8_42], %123 {strides = array<i32>} : memref<32x32xf32, #tpu.memory_space<vmem>>, vector<16x8xf32>,
    %125 = vector.extract_strided_slice %10 {offsets = [16, 16], sizes = [16, 8], strides = [1, 1]} : vector<32x96xf32> to vector<16x8xf32>
    %126 = vector.extract_strided_slice %10 {offsets = [16, 48], sizes = [16, 8], strides = [1, 1]} : vector<32x96xf32> to vector<16x8xf32>
    %127 = vector.extract_strided_slice %10 {offsets = [16, 80], sizes = [16, 8], strides = [1, 1]} : vector<32x96xf32> to vector<16x8xf32>
    "tpu.trace_start"() <{level = 10 : i32, message = "qe,ke->qk"}> : () -> ()
    %cst_43 = arith.constant dense<0.000000e+00> : vector<16x16xf32>
    %128 = tpu.matmul %125, %126, %cst_43 {dimension_numbers = #tpu.dot_dimension_numbers<[1], [1], [0], [0], [0, 0, 1, 0], [], []>} : vector<16x8xf32>, vector<16x8xf32>, vector<16x16xf32> -> vector<16x16xf32>
    "tpu.trace_stop"() : () -> ()
    %129 = vector.broadcast %16 : vector<1x16xf32> to vector<16x16xf32>
    %130 = arith.addf %128, %129 : vector<16x16xf32>
    %cst_44 = arith.constant dense<0xFF800000> : vector<16xf32>
    %131 = vector.multi_reduction <maximumf>, %130, %cst_44 [1] : vector<16x16xf32> to vector<16xf32>
    %132 = vector.shape_cast %131 : vector<16xf32> to vector<16x1xf32>
    %133 = vector.broadcast %132 : vector<16x1xf32> to vector<16x16xf32>
    %134 = arith.subf %130, %133 : vector<16x16xf32>
    %135 = math.exp %134 : vector<16x16xf32>
    %cst_45 = arith.constant dense<0.000000e+00> : vector<16xf32>
    %136 = vector.multi_reduction <add>, %135, %cst_45 [1] : vector<16x16xf32> to vector<16xf32>
    %137 = vector.shape_cast %136 : vector<16xf32> to vector<16x1xf32>
    %138 = tpu.reciprocal %137 {approx = true} : vector<16x1xf32> -> vector<16x1xf32>
    %139 = vector.broadcast %138 : vector<16x1xf32> to vector<16x16xf32>
    %140 = arith.mulf %135, %139 : vector<16x16xf32>
    "tpu.trace_start"() <{level = 10 : i32, message = "qk,ke->qe"}> : () -> ()
    %cst_46 = arith.constant dense<0.000000e+00> : vector<16x8xf32>
    %141 = tpu.matmul %140, %127, %cst_46 {dimension_numbers = #tpu.dot_dimension_numbers<[1], [0], [0], [1], [0, 0, 1, 1], [], []>} : vector<16x16xf32>, vector<16x8xf32>, vector<16x8xf32> -> vector<16x8xf32>
    "tpu.trace_stop"() : () -> ()
    %c16_47 = arith.constant 16 : index
    %c16_48 = arith.constant 16 : index
    %142 = vector.load %arg23[%c16_47, %c16_48] : memref<32x32xf32, #tpu.memory_space<vmem>>, vector<16x8xf32>
    tpu.vector_store %arg23[%c16_47, %c16_48], %141 {strides = array<i32>} : memref<32x32xf32, #tpu.memory_space<vmem>>, vector<16x8xf32>,
    %143 = vector.extract_strided_slice %10 {offsets = [16, 24], sizes = [16, 8], strides = [1, 1]} : vector<32x96xf32> to vector<16x8xf32>
    %144 = vector.extract_strided_slice %10 {offsets = [16, 56], sizes = [16, 8], strides = [1, 1]} : vector<32x96xf32> to vector<16x8xf32>
    %145 = vector.extract_strided_slice %10 {offsets = [16, 88], sizes = [16, 8], strides = [1, 1]} : vector<32x96xf32> to vector<16x8xf32>
    "tpu.trace_start"() <{level = 10 : i32, message = "qe,ke->qk"}> : () -> ()
    %cst_49 = arith.constant dense<0.000000e+00> : vector<16x16xf32>
    %146 = tpu.matmul %143, %144, %cst_49 {dimension_numbers = #tpu.dot_dimension_numbers<[1], [1], [0], [0], [0, 0, 1, 0], [], []>} : vector<16x8xf32>, vector<16x8xf32>, vector<16x16xf32> -> vector<16x16xf32>
    "tpu.trace_stop"() : () -> ()
    %147 = vector.broadcast %16 : vector<1x16xf32> to vector<16x16xf32>
    %148 = arith.addf %146, %147 : vector<16x16xf32>
    %cst_50 = arith.constant dense<0xFF800000> : vector<16xf32>
    %149 = vector.multi_reduction <maximumf>, %148, %cst_50 [1] : vector<16x16xf32> to vector<16xf32>
    %150 = vector.shape_cast %149 : vector<16xf32> to vector<16x1xf32>
    %151 = vector.broadcast %150 : vector<16x1xf32> to vector<16x16xf32>
    %152 = arith.subf %148, %151 : vector<16x16xf32>
    %153 = math.exp %152 : vector<16x16xf32>
    %cst_51 = arith.constant dense<0.000000e+00> : vector<16xf32>
    %154 = vector.multi_reduction <add>, %153, %cst_51 [1] : vector<16x16xf32> to vector<16xf32>
    %155 = vector.shape_cast %154 : vector<16xf32> to vector<16x1xf32>
    %156 = tpu.reciprocal %155 {approx = true} : vector<16x1xf32> -> vector<16x1xf32>
    %157 = vector.broadcast %156 : vector<16x1xf32> to vector<16x16xf32>
    %158 = arith.mulf %153, %157 : vector<16x16xf32>
    "tpu.trace_start"() <{level = 10 : i32, message = "qk,ke->qe"}> : () -> ()
    %cst_52 = arith.constant dense<0.000000e+00> : vector<16x8xf32>
    %159 = tpu.matmul %158, %145, %cst_52 {dimension_numbers = #tpu.dot_dimension_numbers<[1], [0], [0], [1], [0, 0, 1, 1], [], []>} : vector<16x16xf32>, vector<16x8xf32>, vector<16x8xf32> -> vector<16x8xf32>
    "tpu.trace_stop"() : () -> ()
    %c16_53 = arith.constant 16 : index
    %c24_54 = arith.constant 24 : index
    %160 = vector.load %arg23[%c16_53, %c24_54] : memref<32x32xf32, #tpu.memory_space<vmem>>, vector<16x8xf32>
    tpu.vector_store %arg23[%c16_53, %c24_54], %159 {strides = array<i32>} : memref<32x32xf32, #tpu.memory_space<vmem>>, vector<16x8xf32>,
    %c0_55 = arith.constant 0 : index
    %c0_56 = arith.constant 0 : index
    %161 = vector.load %arg23[%c0_55, %c0_56] : memref<32x32xf32, #tpu.memory_space<vmem>>, vector<32x32xf32>
    %c0_57 = arith.constant 0 : index
    %c0_58 = arith.constant 0 : index
    %c0_59 = arith.constant 0 : index
    %162 = vector.load %arg7[%c0_57, %c0_58, %c0_59] : memref<1x32x32xf32, #tpu.memory_space<vmem>>, vector<1x32x32xf32>
    %163 = vector.shape_cast %162 : vector<1x32x32xf32> to vector<32x32xf32>
    %cst_60 = arith.constant dense<0.000000e+00> : vector<32x32xf32>
    %164 = tpu.matmul %161, %163, %cst_60 {dimension_numbers = #tpu.dot_dimension_numbers<[1], [0], [0], [1], [0, 0, 1, 1], [], []>} : vector<32x32xf32>, vector<32x32xf32>, vector<32x32xf32> -> vector<32x32xf32>
    %c0_61 = arith.constant 0 : index
    %c0_62 = arith.constant 0 : index
    %c0_63 = arith.constant 0 : index
    %165 = vector.load %arg8[%c0_61, %c0_62, %c0_63] : memref<1x1x32xf32, #tpu.memory_space<vmem>>, vector<1x1x32xf32>
    %166 = vector.shape_cast %165 : vector<1x1x32xf32> to vector<1x32xf32>
    %167 = vector.broadcast %166 : vector<1x32xf32> to vector<32x32xf32>
    %168 = arith.addf %164, %167 : vector<32x32xf32>
    %169 = arith.addf %3, %168 : vector<32x32xf32>
    %c0_64 = arith.constant 0 : index
    %c0_65 = arith.constant 0 : index
    %c0_66 = arith.constant 0 : index
    %170 = vector.load %arg9[%c0_64, %c0_65, %c0_66] : memref<1x1x32xf32, #tpu.memory_space<vmem>>, vector<1x1x32xf32>
    %171 = vector.shape_cast %170 : vector<1x1x32xf32> to vector<1x32xf32>
    %c0_67 = arith.constant 0 : index
    %c0_68 = arith.constant 0 : index
    %c0_69 = arith.constant 0 : index
    %172 = vector.load %arg10[%c0_67, %c0_68, %c0_69] : memref<1x1x32xf32, #tpu.memory_space<vmem>>, vector<1x1x32xf32>
    %173 = vector.shape_cast %172 : vector<1x1x32xf32> to vector<1x32xf32>
    %cst_70 = arith.constant dense<0.000000e+00> : vector<32xf32>
    %174 = vector.multi_reduction <add>, %169, %cst_70 [1] : vector<32x32xf32> to vector<32xf32>
    %175 = vector.shape_cast %174 : vector<32xf32> to vector<32x1xf32>
    %cst_71 = arith.constant 3.200000e+01 : f32
    %176 = vector.broadcast %cst_71 : f32 to vector<32x1xf32>
    %177 = arith.divf %175, %176 : vector<32x1xf32>
    %178 = vector.broadcast %177 : vector<32x1xf32> to vector<32x32xf32>
    %179 = arith.subf %169, %178 : vector<32x32xf32>
    %180 = arith.mulf %179, %179 : vector<32x32xf32>
    %cst_72 = arith.constant dense<0.000000e+00> : vector<32xf32>
    %181 = vector.multi_reduction <add>, %180, %cst_72 [1] : vector<32x32xf32> to vector<32xf32>
    %182 = vector.shape_cast %181 : vector<32xf32> to vector<32x1xf32>
    %cst_73 = arith.constant 3.200000e+01 : f32
    %183 = vector.broadcast %cst_73 : f32 to vector<32x1xf32>
    %184 = arith.divf %182, %183 : vector<32x1xf32>
    %cst_74 = arith.constant 9.99999974E-6 : f32
    %185 = vector.broadcast %cst_74 : f32 to vector<32x1xf32>
    %186 = arith.addf %184, %185 : vector<32x1xf32>
    %187 = math.rsqrt %186 : vector<32x1xf32>
    %188 = vector.broadcast %187 : vector<32x1xf32> to vector<32x32xf32>
    %189 = arith.mulf %179, %188 : vector<32x32xf32>
    %190 = vector.broadcast %171 : vector<1x32xf32> to vector<32x32xf32>
    %191 = arith.mulf %189, %190 : vector<32x32xf32>
    %192 = vector.broadcast %173 : vector<1x32xf32> to vector<32x32xf32>
    %193 = arith.addf %191, %192 : vector<32x32xf32>
    %c0_75 = arith.constant 0 : index
    %c0_76 = arith.constant 0 : index
    %c0_77 = arith.constant 0 : index
    %194 = vector.load %arg11[%c0_75, %c0_76, %c0_77] : memref<1x32x64xf32, #tpu.memory_space<vmem>>, vector<1x32x64xf32>
    %195 = vector.shape_cast %194 : vector<1x32x64xf32> to vector<32x64xf32>
    %cst_78 = arith.constant dense<0.000000e+00> : vector<32x64xf32>
    %196 = tpu.matmul %193, %195, %cst_78 {dimension_numbers = #tpu.dot_dimension_numbers<[1], [0], [0], [1], [0, 0, 1, 1], [], []>} : vector<32x32xf32>, vector<32x64xf32>, vector<32x64xf32> -> vector<32x64xf32>
    %c0_79 = arith.constant 0 : index
    %c0_80 = arith.constant 0 : index
    %c0_81 = arith.constant 0 : index
    %197 = vector.load %arg12[%c0_79, %c0_80, %c0_81] : memref<1x1x64xf32, #tpu.memory_space<vmem>>, vector<1x1x64xf32>
    %198 = vector.shape_cast %197 : vector<1x1x64xf32> to vector<1x64xf32>
    %199 = vector.broadcast %198 : vector<1x64xf32> to vector<32x64xf32>
    %200 = arith.addf %196, %199 : vector<32x64xf32>
    %cst_82 = arith.constant 0.000000e+00 : f32
    %201 = vector.broadcast %cst_82 : f32 to vector<32x64xf32>
    %202 = arith.maximumf %200, %201 : vector<32x64xf32>
    %c0_83 = arith.constant 0 : index
    %c0_84 = arith.constant 0 : index
    %c0_85 = arith.constant 0 : index
    %203 = vector.load %arg13[%c0_83, %c0_84, %c0_85] : memref<1x64x32xf32, #tpu.memory_space<vmem>>, vector<1x64x32xf32>
    %204 = vector.shape_cast %203 : vector<1x64x32xf32> to vector<64x32xf32>
    %cst_86 = arith.constant dense<0.000000e+00> : vector<32x32xf32>
    %205 = tpu.matmul %202, %204, %cst_86 {dimension_numbers = #tpu.dot_dimension_numbers<[1], [0], [0], [1], [0, 0, 1, 1], [], []>} : vector<32x64xf32>, vector<64x32xf32>, vector<32x32xf32> -> vector<32x32xf32>
    %c0_87 = arith.constant 0 : index
    %c0_88 = arith.constant 0 : index
    %c0_89 = arith.constant 0 : index
    %206 = vector.load %arg14[%c0_87, %c0_88, %c0_89] : memref<1x1x32xf32, #tpu.memory_space<vmem>>, vector<1x1x32xf32>
    %207 = vector.shape_cast %206 : vector<1x1x32xf32> to vector<1x32xf32>
    %208 = vector.broadcast %207 : vector<1x32xf32> to vector<32x32xf32>
    %209 = arith.addf %205, %208 : vector<32x32xf32>
    %210 = arith.addf %193, %209 : vector<32x32xf32>
    %c0_90 = arith.constant 0 : index
    %c0_91 = arith.constant 0 : index
    %c0_92 = arith.constant 0 : index
    %211 = vector.load %arg15[%c0_90, %c0_91, %c0_92] : memref<1x1x32xf32, #tpu.memory_space<vmem>>, vector<1x1x32xf32>
    %212 = vector.shape_cast %211 : vector<1x1x32xf32> to vector<1x32xf32>
    %c0_93 = arith.constant 0 : index
    %c0_94 = arith.constant 0 : index
    %c0_95 = arith.constant 0 : index
    %213 = vector.load %arg16[%c0_93, %c0_94, %c0_95] : memref<1x1x32xf32, #tpu.memory_space<vmem>>, vector<1x1x32xf32>
    %214 = vector.shape_cast %213 : vector<1x1x32xf32> to vector<1x32xf32>
    %cst_96 = arith.constant dense<0.000000e+00> : vector<32xf32>
    %215 = vector.multi_reduction <add>, %210, %cst_96 [1] : vector<32x32xf32> to vector<32xf32>
    %216 = vector.shape_cast %215 : vector<32xf32> to vector<32x1xf32>
    %cst_97 = arith.constant 3.200000e+01 : f32
    %217 = vector.broadcast %cst_97 : f32 to vector<32x1xf32>
    %218 = arith.divf %216, %217 : vector<32x1xf32>
    %219 = vector.broadcast %218 : vector<32x1xf32> to vector<32x32xf32>
    %220 = arith.subf %210, %219 : vector<32x32xf32>
    %221 = arith.mulf %220, %220 : vector<32x32xf32>
    %cst_98 = arith.constant dense<0.000000e+00> : vector<32xf32>
    %222 = vector.multi_reduction <add>, %221, %cst_98 [1] : vector<32x32xf32> to vector<32xf32>
    %223 = vector.shape_cast %222 : vector<32xf32> to vector<32x1xf32>
    %cst_99 = arith.constant 3.200000e+01 : f32
    %224 = vector.broadcast %cst_99 : f32 to vector<32x1xf32>
    %225 = arith.divf %223, %224 : vector<32x1xf32>
    %cst_100 = arith.constant 9.99999974E-6 : f32
    %226 = vector.broadcast %cst_100 : f32 to vector<32x1xf32>
    %227 = arith.addf %225, %226 : vector<32x1xf32>
    %228 = math.rsqrt %227 : vector<32x1xf32>
    %229 = vector.broadcast %228 : vector<32x1xf32> to vector<32x32xf32>
    %230 = arith.mulf %220, %229 : vector<32x32xf32>
    %231 = vector.broadcast %212 : vector<1x32xf32> to vector<32x32xf32>
    %232 = arith.mulf %230, %231 : vector<32x32xf32>
    %233 = vector.broadcast %214 : vector<1x32xf32> to vector<32x32xf32>
    %234 = arith.addf %232, %233 : vector<32x32xf32>
    %c0_101 = arith.constant 0 : index
    %c0_102 = arith.constant 0 : index
    %235 = vector.load %arg22[%c0_101, %c0_102] : memref<32x32xf32, #tpu.memory_space<vmem>>, vector<32x32xf32>
    tpu.vector_store %arg22[%c0_101, %c0_102], %234 {strides = array<i32>} : memref<32x32xf32, #tpu.memory_space<vmem>>, vector<32x32xf32>,
    %c1_i32 = arith.constant 1 : i32
    %236 = arith.cmpi eq, %arg1, %c1_i32 : i32
    %237 = arith.extui %236 : i1 to i32
    %c0_i32_103 = arith.constant 0 : i32
    %238 = arith.cmpi ne, %237, %c0_i32_103 : i32
    scf.if %238 {
      %239 = vector.extract_strided_slice %234 {offsets = [0, 0], sizes = [1, 32], strides = [1, 1]} : vector<32x32xf32> to vector<1x32xf32>
      %240 = vector.extract_strided_slice %234 {offsets = [16, 0], sizes = [1, 32], strides = [1, 1]} : vector<32x32xf32> to vector<1x32xf32>
      %241 = tpu.concatenate %239, %240 in 0 : vector<1x32xf32>, vector<1x32xf32> -> vector<2x32xf32>
      %c0_104 = arith.constant 0 : index
      %c0_105 = arith.constant 0 : index
      %242 = vector.load %arg17[%c0_104, %c0_105] : memref<1x32xf32, #tpu.memory_space<vmem>>, vector<1x32xf32>
      %c0_106 = arith.constant 0 : index
      %c0_107 = arith.constant 0 : index
      %243 = vector.load %arg18[%c0_106, %c0_107] : memref<1x32xf32, #tpu.memory_space<vmem>>, vector<1x32xf32>
      %cst_108 = arith.constant dense<0.000000e+00> : vector<2xf32>
      %244 = vector.multi_reduction <add>, %241, %cst_108 [1] : vector<2x32xf32> to vector<2xf32>
      %245 = vector.shape_cast %244 : vector<2xf32> to vector<2x1xf32>
      %cst_109 = arith.constant 3.200000e+01 : f32
      %246 = vector.broadcast %cst_109 : f32 to vector<2x1xf32>
      %247 = arith.divf %245, %246 : vector<2x1xf32>
      %248 = vector.broadcast %247 : vector<2x1xf32> to vector<2x32xf32>
      %249 = arith.subf %241, %248 : vector<2x32xf32>
      %250 = arith.mulf %249, %249 : vector<2x32xf32>
      %cst_110 = arith.constant dense<0.000000e+00> : vector<2xf32>
      %251 = vector.multi_reduction <add>, %250, %cst_110 [1] : vector<2x32xf32> to vector<2xf32>
      %252 = vector.shape_cast %251 : vector<2xf32> to vector<2x1xf32>
      %cst_111 = arith.constant 3.200000e+01 : f32
      %253 = vector.broadcast %cst_111 : f32 to vector<2x1xf32>
      %254 = arith.divf %252, %253 : vector<2x1xf32>
      %cst_112 = arith.constant 9.99999974E-6 : f32
      %255 = vector.broadcast %cst_112 : f32 to vector<2x1xf32>
      %256 = arith.addf %254, %255 : vector<2x1xf32>
      %257 = math.rsqrt %256 : vector<2x1xf32>
      %258 = vector.broadcast %257 : vector<2x1xf32> to vector<2x32xf32>
      %259 = arith.mulf %249, %258 : vector<2x32xf32>
      %260 = vector.broadcast %242 : vector<1x32xf32> to vector<2x32xf32>
      %261 = arith.mulf %259, %260 : vector<2x32xf32>
      %262 = vector.broadcast %243 : vector<1x32xf32> to vector<2x32xf32>
      %263 = arith.addf %261, %262 : vector<2x32xf32>
      %c0_113 = arith.constant 0 : index
      %c0_114 = arith.constant 0 : index
      %264 = vector.load %arg19[%c0_113, %c0_114] : memref<32x20xf32, #tpu.memory_space<vmem>>, vector<32x20xf32>
      %cst_115 = arith.constant dense<0.000000e+00> : vector<2x20xf32>
      %265 = tpu.matmul %263, %264, %cst_115 {dimension_numbers = #tpu.dot_dimension_numbers<[1], [0], [0], [1], [0, 0, 1, 1], [], []>} : vector<2x32xf32>, vector<32x20xf32>, vector<2x20xf32> -> vector<2x20xf32>
      %c0_116 = arith.constant 0 : index
      %c0_117 = arith.constant 0 : index
      %266 = vector.load %arg20[%c0_116, %c0_117] : memref<1x20xf32, #tpu.memory_space<vmem>>, vector<1x20xf32>
      %267 = vector.broadcast %266 : vector<1x20xf32> to vector<2x20xf32>
      %268 = arith.addf %265, %267 : vector<2x20xf32>
      %c0_118 = arith.constant 0 : index
      %c0_119 = arith.constant 0 : index
      %c0_120 = arith.constant 0 : index
      %269 = vector.load %arg21[%c0_118, %c0_119, %c0_120] : memref<1x2x20xf32, #tpu.memory_space<vmem>>, vector<1x2x20xf32>
      %270 = vector.shape_cast %269 : vector<1x2x20xf32> to vector<2x20xf32>
      %271 = vector.shape_cast %268 : vector<2x20xf32> to vector<1x2x20xf32>
      tpu.vector_store %arg21[%c0_118, %c0_119, %c0_120], %271 {strides = array<i32>} : memref<1x2x20xf32, #tpu.memory_space<vmem>>, vector<1x2x20xf32>,
    } else {
    }
    return
  }
  func.func @transform_0(%arg0: i32, %arg1: i32) -> (i32, i32) {
    %c0_i32 = arith.constant 0 : i32
    %c0_i32_0 = arith.constant 0 : i32
    return %arg0, %c0_i32 : i32, i32
  }
  func.func @transform_1(%arg0: i32, %arg1: i32) -> (i32, i32) {
    %c0_i32 = arith.constant 0 : i32
    %c0_i32_0 = arith.constant 0 : i32
    %c0_i32_1 = arith.constant 0 : i32
    return %c0_i32, %c0_i32_0 : i32, i32
  }
  func.func @transform_2(%arg0: i32, %arg1: i32) -> (i32, i32) {
    %c0_i32 = arith.constant 0 : i32
    %c0_i32_0 = arith.constant 0 : i32
    %c0_i32_1 = arith.constant 0 : i32
    return %c0_i32, %c0_i32_0 : i32, i32
  }
  func.func @transform_3(%arg0: i32, %arg1: i32) -> (i32, i32, i32) {
    %c0_i32 = arith.constant 0 : i32
    %c0_i32_0 = arith.constant 0 : i32
    %c0_i32_1 = arith.constant 0 : i32
    return %arg1, %c0_i32, %c0_i32_0 : i32, i32, i32
  }
  func.func @transform_4(%arg0: i32, %arg1: i32) -> (i32, i32, i32) {
    %c0_i32 = arith.constant 0 : i32
    %c0_i32_0 = arith.constant 0 : i32
    %c0_i32_1 = arith.constant 0 : i32
    return %arg1, %c0_i32, %c0_i32_0 : i32, i32, i32
  }
  func.func @transform_5(%arg0: i32, %arg1: i32) -> (i32, i32, i32) {
    %c0_i32 = arith.constant 0 : i32
    %c0_i32_0 = arith.constant 0 : i32
    %c0_i32_1 = arith.constant 0 : i32
    return %arg1, %c0_i32, %c0_i32_0 : i32, i32, i32
  }
  func.func @transform_6(%arg0: i32, %arg1: i32) -> (i32, i32, i32) {
    %c0_i32 = arith.constant 0 : i32
    %c0_i32_0 = arith.constant 0 : i32
    %c0_i32_1 = arith.constant 0 : i32
    return %arg1, %c0_i32, %c0_i32_0 : i32, i32, i32
  }
  func.func @transform_7(%arg0: i32, %arg1: i32) -> (i32, i32, i32) {
    %c0_i32 = arith.constant 0 : i32
    %c0_i32_0 = arith.constant 0 : i32
    %c0_i32_1 = arith.constant 0 : i32
    return %arg1, %c0_i32, %c0_i32_0 : i32, i32, i32
  }
  func.func @transform_8(%arg0: i32, %arg1: i32) -> (i32, i32, i32) {
    %c0_i32 = arith.constant 0 : i32
    %c0_i32_0 = arith.constant 0 : i32
    %c0_i32_1 = arith.constant 0 : i32
    return %arg1, %c0_i32, %c0_i32_0 : i32, i32, i32
  }
  func.func @transform_9(%arg0: i32, %arg1: i32) -> (i32, i32, i32) {
    %c0_i32 = arith.constant 0 : i32
    %c0_i32_0 = arith.constant 0 : i32
    %c0_i32_1 = arith.constant 0 : i32
    return %arg1, %c0_i32, %c0_i32_0 : i32, i32, i32
  }
  func.func @transform_10(%arg0: i32, %arg1: i32) -> (i32, i32, i32) {
    %c0_i32 = arith.constant 0 : i32
    %c0_i32_0 = arith.constant 0 : i32
    %c0_i32_1 = arith.constant 0 : i32
    return %arg1, %c0_i32, %c0_i32_0 : i32, i32, i32
  }
  func.func @transform_11(%arg0: i32, %arg1: i32) -> (i32, i32, i32) {
    %c0_i32 = arith.constant 0 : i32
    %c0_i32_0 = arith.constant 0 : i32
    %c0_i32_1 = arith.constant 0 : i32
    return %arg1, %c0_i32, %c0_i32_0 : i32, i32, i32
  }
  func.func @transform_12(%arg0: i32, %arg1: i32) -> (i32, i32, i32) {
    %c0_i32 = arith.constant 0 : i32
    %c0_i32_0 = arith.constant 0 : i32
    %c0_i32_1 = arith.constant 0 : i32
    return %arg1, %c0_i32, %c0_i32_0 : i32, i32, i32
  }
  func.func @transform_13(%arg0: i32, %arg1: i32) -> (i32, i32, i32) {
    %c0_i32 = arith.constant 0 : i32
    %c0_i32_0 = arith.constant 0 : i32
    %c0_i32_1 = arith.constant 0 : i32
    return %arg1, %c0_i32, %c0_i32_0 : i32, i32, i32
  }
  func.func @transform_14(%arg0: i32, %arg1: i32) -> (i32, i32, i32) {
    %c0_i32 = arith.constant 0 : i32
    %c0_i32_0 = arith.constant 0 : i32
    %c0_i32_1 = arith.constant 0 : i32
    return %arg1, %c0_i32, %c0_i32_0 : i32, i32, i32
  }
  func.func @transform_15(%arg0: i32, %arg1: i32) -> (i32, i32) {
    %c0_i32 = arith.constant 0 : i32
    %c0_i32_0 = arith.constant 0 : i32
    %c0_i32_1 = arith.constant 0 : i32
    return %c0_i32, %c0_i32_0 : i32, i32
  }
  func.func @transform_16(%arg0: i32, %arg1: i32) -> (i32, i32) {
    %c0_i32 = arith.constant 0 : i32
    %c0_i32_0 = arith.constant 0 : i32
    %c0_i32_1 = arith.constant 0 : i32
    return %c0_i32, %c0_i32_0 : i32, i32
  }
  func.func @transform_17(%arg0: i32, %arg1: i32) -> (i32, i32) {
    %c0_i32 = arith.constant 0 : i32
    %c0_i32_0 = arith.constant 0 : i32
    %c0_i32_1 = arith.constant 0 : i32
    return %c0_i32, %c0_i32_0 : i32, i32
  }
  func.func @transform_18(%arg0: i32, %arg1: i32) -> (i32, i32) {
    %c0_i32 = arith.constant 0 : i32
    %c0_i32_0 = arith.constant 0 : i32
    %c0_i32_1 = arith.constant 0 : i32
    return %c0_i32, %c0_i32_0 : i32, i32
  }
  func.func @transform_19(%arg0: i32, %arg1: i32) -> (i32, i32, i32) {
    %c0_i32 = arith.constant 0 : i32
    %c0_i32_0 = arith.constant 0 : i32
    %c0_i32_1 = arith.constant 0 : i32
    return %arg0, %c0_i32, %c0_i32_0 : i32, i32, i32
  }
}

</mosaic_0001>

<bundles_post_ra>
// kernel: tpu_custom_call.1
= control target key start
LH: loop header
LB: loop body
LE: loop exit
PB: predicated region body
PF: predicated region fallthrough
CT: control target
= control target key end

     0   :  { %s5353_s0 = inlined_call_operand.vmem [shape: f32[32,16], index: 0, kind: input, shape index: {}]   ;;  %s5354_s1 = inlined_call_operand.vmem [shape: f32[32,32], index: 1, kind: input, shape index: {}]   ;;  %s5355_s2 = inlined_call_operand.hbm [shape: f32[16,32], index: 2, kind: input, shape index: {}]   ;;  %s5356_s3 = inlined_call_operand.vmem [shape: f32[2,32,96], index: 3, kind: input, shape index: {}]   ;;  %s5357_s4 = inlined_call_operand.vmem [shape: f32[2,1,96], index: 4, kind: input, shape index: {}]   ;;  %s5358_s5 = inlined_call_operand.vmem [shape: f32[2,32,32], index: 5, kind: input, shape index: {}]   ;;  %s5359_s6 = inlined_call_operand.vmem [shape: f32[2,1,32], index: 6, kind: input, shape index: {}]   ;;  %s5360_s7 = inlined_call_operand.hbm [shape: f32[2,1,32], index: 7, kind: input, shape index: {}]   ;;  %s5361_s8 = inlined_call_operand.hbm [shape: f32[2,1,32], index: 8, kind: input, shape index: {}]   ;;  %s5362_s9 = inlined_call_operand.vmem [shape: f32[2,32,64], index: 9, kind: input, shape index: {}]   ;;  %s5363_s10 = inlined_call_operand.hbm [shape: f32[2,1,64], index: 10, kind: input, shape index: {}]   ;;  %s5364_s11 = inlined_call_operand.vmem [shape: f32[2,64,32], index: 11, kind: input, shape index: {}]   ;;  %s5365_s12 = inlined_call_operand.hbm [shape: f32[2,1,32], index: 12, kind: input, shape index: {}]   ;;  %s5366_s13 = inlined_call_operand.hbm [shape: f32[2,1,32], index: 13, kind: input, shape index: {}]   ;;  %s5367_s14 = inlined_call_operand.vmem [shape: f32[2,1,32], index: 14, kind: input, shape index: {}]   ;;  %s5368_s15 = inlined_call_operand.vmem [shape: f32[1,32], index: 15, kind: input, shape index: {}]   ;;  %s5369_s16 = inlined_call_operand.vmem [shape: f32[1,32], index: 16, kind: input, shape index: {}]   ;;  %s5370_s17 = inlined_call_operand.vmem [shape: f32[32,20], index: 17, kind: input, shape index: {}]   ;;  %s5371_s18 = inlined_call_operand.vmem [shape: f32[1,20], index: 18, kind: input, shape index: {}]   ;;  %s5372_s19 = inlined_call_operand.hbm [shape: f32[1,2,20], index: 19, kind: output, shape index: {}]  }
   0x1   :  { %5383 = sst [smem:[#allocation26_spill]] %s5353_s0 }
   0x2   :  { %5384 = sst [smem:[#allocation27_spill]] %s5354_s1 }
   0x3   :  { %5385 = sst [smem:[#allocation28_spill]] %s5355_s2 }
   0x4   :  { %5386 = sst [smem:[#allocation29_spill]] %s5356_s3 }
   0x5   :  { %5387 = sst [smem:[#allocation30_spill]] %s5360_s7 }
   0x6   :  { %5388 = sst [smem:[#allocation31_spill]] %s5363_s10 }
   0x7   :  { %5389 = sst [smem:[#allocation32_spill]] %s5364_s11 }
   0x8   :  { %5390 = sst [smem:[#allocation33_spill]] %s5368_s15 }
   0x9   :  { %5391 = sst [smem:[#allocation34_spill]] %s5369_s16 }
   0xa   :  { %5392 = sst [smem:[#allocation35_spill]] %s5370_s17 }
   0xb   :  { %5393 = sst [smem:[#allocation36_spill]] %s5371_s18 }
   0xc   :  { %5394 = sst [smem:[#allocation37_spill]] %s5372_s19 }
   0xd   :  { %24 = vsyncpa [#allocation5], 0 }
   0xe   :  { %25 = vsyncpa [#allocation8], 0 }
   0xf   :  { %27 = vsyncpa [#allocation8 + $0x1], 0 }
  0x10   :  { %28 = vsyncpa [#allocation11], 0 }
  0x11   :  { %30 = vsyncpa [#allocation11 + $0x1], 0 }
  0x12   :  { %31 = vsyncpa [#allocation14], 0 }
  0x13   :  { %33 = vsyncpa [#allocation14 + $0x1], 0 }
  0x14   :  { %34 = vsyncpa [#allocation6], 0  ;;  %s4678_s0 = smov 0   ;;  %s4680_s30 = smov 0  }
  0x15   :  { %s4682_s20 = smov 0   ;;  %s4684_s21 = smov 0  }
  0x16   :  { %s4686_s1 = smov 0   ;;  %s4688_s22 = smov 0  }
  0x17 LB: > { %5395 = sst [smem:[#allocation21_spill]] %s4538_s20  ;;  %s49_s2 = sadd.s32 1, %s4546_s1  ;;  %s4550_s22 = sphi %s4688_s22, %s40_s22   ;;  %s4546_s1 = sphi %s4686_s1, %s5434_s1   ;;  %s4542_s21 = sphi %s4684_s21, %s5433_s21   ;;  %s4538_s20 = sphi %s4682_s20, %s5432_s20   ;;  %s4534_s30 = sphi %s4680_s30, %s5436_s30   ;;  %s4530_s0 = sphi %s4678_s0, %s5435_s0  }
  0x18   : > { %5396 = sst [smem:[#allocation22_spill]] %s4546_s1  ;;  %s231_s23 = sadd.s32 1, %s4538_s20 }
  0x19   : > { %5397 = sst [smem:[#allocation23_spill]] %s4550_s22  ;;  %p50_p0 = scmp.ge.s32.totalorder %s49_s2, 2 }
  0x1a   : > { %p238_p1 = scmp.ne.s32.totalorder %s4538_s20, %s4534_s30  ;;  %p239_p2 = scmp.eq.s32.totalorder %s4550_s22, 0 }
  0x1b   : > { %s5438_s2 = smov (%p50_p0, %s49_s2), 0  ;;  %p4135_p4 = scmp.lt.s32.totalorder %s4550_s22, 2 }
  0x1c   : > { %5398 = sst [smem:[#allocation24_spill]] %s5438_s2  ;;  %p240_p3 = por %p239_p2, %p238_p1 }
  0x1d   : > { %s228_s24 = ssub.s32 %s4546_s1, %s5438_s2  ;;  %s5376_s25 = sand.u32 1, %s4550_s22  }
  0x1e   : > { %p229_p5 = scmp.eq.s32.totalorder %s228_s24, 0  ;;  %s4720_s3 = sand.u32 1, %s4538_s20  }
  0x1f   : > { %s4723_s26 = sshll.u32 %s4546_s1, 4  ;;  %s5400_s7 = sld [smem:[#allocation30_spill]] }
  0x20   : > { %s4726_s27 = scalar_select %p229_p5, %s4538_s20, %s231_s23  }
  0x21   : > { %s628_s18 = scalar_lea.vmem [#allocation7], %s4720_s3  ;;  %p4733_p6 = pnand %p4135_p4, %p240_p3 }
  0x22   : > { %5399 = sst [smem:[#allocation25_spill]] %s4726_s27  ;;  %s635_s16 = sshll.u32 %s628_s18, 4  ;;  %s636_s16 = int_to_ptr.vmem [resolvable:$true] %s635_s16 }
  0x23   : > { %s4739_s24 = scalar_lea.sflag [#allocation8], %s5376_s25  ;;  %p4743_p7 = pneg %p4733_p6 }
  0x24   : > { %s4307_s23 = scalar_lea.vmem %s636_s16, 16  ;;  %s4552_s18 = smov [#allocation7]  }
  0x25   : > { %s633_s19 = scalar_lea.hbm %s5400_s7, %s4723_s26  ;;  %p4308_p8 = scmp.ne.s32.totalorder %s636_s16, %s4307_s23 }
  0x26   : > { %s4312_s28 = sshll.u32 %s4552_s18, 4  ;;  %s4313_s28 = int_to_ptr.vmem [resolvable:$false] %s4312_s28 }
  0x27   : > { %p4310_p9 = pnand %p4308_p8, %p4743_p7  ;;  %s4314_s29 = scalar_lea.vmem %s4313_s28, 32 }
  0x28   : > { %p4315_p11 = scmp.lt.s32.totalorder %s636_s16, %s4313_s28  ;;  %p4316_p12 = scmp.lt.s32.totalorder %s4314_s29, %s4307_s23 }
  0x29   : > { %p4311_p10 = pneg %p4310_p9 }
  0x2a   : > { %p4317_p13 = por %p4316_p12, %p4315_p11 }
  0x2c   : > { %p4318_p0 = pnand %p4317_p13, %p4311_p10 }
  0x2e   : > { %4321 = shalt.err (!%p4318_p0)
}
  0x2f   : > { %4121 = dma.hbm_to_vmem [thread:$0]  (!%p4733_p6), %s633_s19, 16, %s636_s16, %s4739_s24  }
  0x30   : > { %s5403_s10 = sld [smem:[#allocation31_spill]]  ;;  %s670_s18 = scalar_lea.vmem [#allocation10], %s4720_s3 }
  0x31   : > { %s677_s27 = sshll.u32 %s670_s18, 4  ;;  %s5404_s28 = sand.u32 1, %s4550_s22   ;;  %s678_s27 = int_to_ptr.vmem [resolvable:$true] %s677_s27 }
  0x32   : > { %s4759_s23 = scalar_lea.sflag [#allocation11], %s5404_s28  ;;  %s4335_s29 = scalar_lea.vmem %s678_s27, 16 }
  0x33   : > { %p4336_p1 = scmp.ne.s32.totalorder %s678_s27, %s4335_s29  ;;  %s4553_s20 = smov [#allocation10]  }
  0x34   : > { %s4340_s17 = sshll.u32 %s4553_s20, 4  ;;  %s4341_s17 = int_to_ptr.vmem [resolvable:$false] %s4340_s17 }
  0x35   : > { %p4338_p2 = pnand %p4336_p1, %p4743_p7  ;;  %s4342_s11 = scalar_lea.vmem %s4341_s17, 32 }
  0x36   : > { %s675_s1 = scalar_lea.hbm %s5403_s10, %s4723_s26  ;;  %p4343_p4 = scmp.lt.s32.totalorder %s678_s27, %s4341_s17 }
  0x37   : > { %p4339_p3 = pneg %p4338_p2  ;;  %p4344_p5 = scmp.lt.s32.totalorder %s4342_s11, %s4335_s29 }
  0x39   : > { %p4345_p8 = por %p4344_p5, %p4343_p4 }
  0x3b   : > { %p4346_p9 = pnand %p4345_p8, %p4339_p3 }
  0x3d   : > { %4349 = shalt.err (!%p4346_p9)
}
  0x3e   : > { %4127 = dma.hbm_to_vmem [thread:$0]  (!%p4733_p6), %s675_s1, 16, %s678_s27, %s4759_s23  }
  0x3f   : > { %s4767_s7 = sadd.s32 4294967295, %s4550_s22   ;;  %p244_p10 = scmp.ne.s32.totalorder %s4534_s30, %s4530_s0 }
  0x40   : > { %p5380_p11 = scmp.eq.s32.totalorder %s4767_s7, 0  ;;  %p3675_p12 = scmp.ge.s32.totalorder %s4550_s22, 1 }
  0x41   : > { %p547_p13 = scmp.lt.s32.totalorder %s4550_s22, 3  ;;  %s4554_s17 = smov [#allocation4]  }
  0x42   : > { %p4776_p0 = por %p5380_p11, %p244_p10  ;;  %s571_s19 = sshll.u32 %s4554_s17, 4  ;;  %s572_s19 = int_to_ptr.vmem [resolvable:$true] %s571_s19 }
  0x43   : > { %p4780_p1 = pnand %p3675_p12, %p547_p13  ;;  %s645_s27 = scalar_lea.vmem [#allocation9], %s4720_s3 }
  0x44   : > { %s5405_s11 = scalar_select %p4776_p0, 1, 0 }
  0x45   : > { %p4114_p2 = pneg %p4780_p1  ;;  %s652_s18 = sshll.u32 %s645_s27, 4  ;;  %s653_s18 = int_to_ptr.vmem [resolvable:$true] %s652_s18 }
  0x46   : > { %s4361_s28 = scalar_lea.vmem %s572_s19, 256  ;;  %p4369_p10 = scmp.lt.s32.totalorder %s572_s19, %s572_s19 }
  0x47   : > { %p4788_p3 = pnand %p4114_p2, %p5380_p11  ;;  %p4362_p5 = scmp.ne.s32.totalorder %s572_s19, %s4361_s28 }
  0x48   : > { %p4370_p12 = scmp.lt.s32.totalorder %s4361_s28, %s4361_s28 }
  0x49   : > { %p4352_p4 = pneg %p4788_p3 }
  0x4a   : > { %p4371_p13 = por %p4370_p12, %p4369_p10 }
  0x4b   : > { %p4364_p8 = pnand %p4362_p5, %p4352_p4 }
  0x4d   : > { %p4365_p9 = pneg %p4364_p8 }
  0x4f   : > { %p4372_p2 = pnand %p4371_p13, %p4365_p9 }
  0x51   : > { %4375 = shalt.err (!%p4372_p2)
}
  0x52   : > { %s4555_s29 = smov 128   ;;  %s4556_s17 = smov 8  }
  0x53   : > { %s5408_s27 = sld [smem:[#allocation28_spill]]  ;;  %s4389_s25 = scalar_lea.vmem %s653_s18, 16 }
  0x54   : > { %p4390_p11 = scmp.ne.s32.totalorder %s653_s18, %s4389_s25  ;;  %s4557_s10 = smov [#allocation9]  }
  0x55   : > { %s4394_s22 = sshll.u32 %s4557_s10, 4  ;;  %s4395_s22 = int_to_ptr.vmem [resolvable:$false] %s4394_s22 }
  0x56   : > { %p4392_p0 = pnand %p4390_p11, %p4743_p7  ;;  %s4396_s28 = scalar_lea.vmem %s4395_s22, 32 }
  0x57   : > { %p4397_p5 = scmp.lt.s32.totalorder %s653_s18, %s4395_s22  ;;  %p4398_p8 = scmp.lt.s32.totalorder %s4396_s28, %s4389_s25 }
  0x58   : > { %p4393_p4 = pneg %p4392_p0 }
  0x59   : > { %4117 = dma.hbm_to_vmem [thread:$0]  (!%p4788_p3), %s5408_s27, 256, %s572_s19, [#allocation5], %s4555_s29, %s4555_s29, %s4556_s17  }
  0x5a   : > { %p4399_p9 = por %p4398_p8, %p4397_p5 }
  0x5c   : > { %p4400_p10 = pnand %p4399_p9, %p4393_p4 }
  0x5e   : > { %4403 = shalt.err (!%p4400_p10)
}
  0x5f   : > { %s5409_s19 = scalar_lea.hbm %s5361_s8, %s4723_s26  ;;  %s700_s22 = scalar_lea.hbm %s5365_s12, %s4723_s26 }
  0x60   : > { %4124 = dma.hbm_to_vmem [thread:$0]  (!%p4733_p6), %s5409_s19, 16, %s653_s18, %s4739_s24  }
  0x61   : > { %s695_s25 = scalar_lea.vmem [#allocation12], %s4720_s3  ;;  %s4558_s27 = smov [#allocation12]  }
  0x62   : > { %s702_s17 = sshll.u32 %s695_s25, 4  ;;  %s4422_s28 = sshll.u32 %s4558_s27, 4  ;;  %s703_s17 = int_to_ptr.vmem [resolvable:$true] %s702_s17  ;;  %s4423_s28 = int_to_ptr.vmem [resolvable:$false] %s4422_s28 }
  0x63   : > { %s4417_s1 = scalar_lea.vmem %s703_s17, 16  ;;  %s4424_s0 = scalar_lea.vmem %s4423_s28, 32 }
  0x64   : > { %p4418_p11 = scmp.ne.s32.totalorder %s703_s17, %s4417_s1  ;;  %p4425_p12 = scmp.lt.s32.totalorder %s703_s17, %s4423_s28 }
  0x65   : > { %p4426_p13 = scmp.lt.s32.totalorder %s4424_s0, %s4417_s1 }
  0x66   : > { %p4420_p0 = pnand %p4418_p11, %p4743_p7 }
  0x67   : > { %p4427_p2 = por %p4426_p13, %p4425_p12 }
  0x68   : > { %p4421_p3 = pneg %p4420_p0 }
  0x6a   : > { %p4428_p4 = pnand %p4427_p2, %p4421_p3 }
  0x6c   : > { %4431 = shalt.err (!%p4428_p4)
}
  0x6d   : > { %4130 = dma.hbm_to_vmem [thread:$0]  (!%p4733_p6), %s700_s22, 16, %s703_s17, %s4759_s23  }
  0x6e   : > { %s717_s20 = scalar_lea.hbm %s5366_s13, %s4723_s26  ;;  %s712_s19 = scalar_lea.vmem [#allocation13], %s4720_s3 }
  0x6f   : > { %s719_s10 = sshll.u32 %s712_s19, 4  ;;  %s710_s29 = scalar_lea.sflag [#allocation14], %s4720_s3  ;;  %s720_s10 = int_to_ptr.vmem [resolvable:$true] %s719_s10 }
  0x70   : > { %s4445_s25 = scalar_lea.vmem %s720_s10, 16  ;;  %s4559_s1 = smov [#allocation13]  }
  0x71   : > { %p4446_p5 = scmp.ne.s32.totalorder %s720_s10, %s4445_s25  ;;  %s4450_s27 = sshll.u32 %s4559_s1, 4  ;;  %s4451_s27 = int_to_ptr.vmem [resolvable:$false] %s4450_s27 }
  0x72   : > { %s4452_s28 = scalar_lea.vmem %s4451_s27, 32  ;;  %p4453_p10 = scmp.lt.s32.totalorder %s720_s10, %s4451_s27 }
  0x73   : > { %p4448_p8 = pnand %p4446_p5, %p4743_p7  ;;  %p4454_p11 = scmp.lt.s32.totalorder %s4452_s28, %s4445_s25 }
  0x75   : > { %p4449_p9 = pneg %p4448_p8  ;;  %p4455_p0 = por %p4454_p11, %p4453_p10 }
  0x77   : > { %p4456_p3 = pnand %p4455_p0, %p4449_p9 }
  0x79   : > { %4459 = shalt.err (!%p4456_p3)
}
  0x7a   : > { %4133 = dma.hbm_to_vmem [thread:$0]  (!%p4733_p6), %s717_s20, 16, %s720_s10, %s710_s29  }
  0x7b   : > { %734 = sbr.rel (%p4780_p1) target bundleno = 5914 (0x171a), region = 96  ;;  %p5410_p12 = scmp.eq.s32.totalorder (!%p4780_p1), %s4767_s7, 0 }
  0x80   : > { %4509 = dma.done.wait (%p5410_p12), [#allocation5], 256   ;;  %p5411_p7 = pmov %p5410_p12 }
  0x81   : > { %s740_s2 = sand.u32 1, %s4767_s7   ;;  %s4842_s3 = sand.u32 1, %s4534_s30  }
  0x82   : > { %4511 = vsyncadd (%p5411_p7), [#allocation5], 4294967040  ;;  %s741_s26 = scalar_lea.sflag [#allocation8], %s740_s2  ;;  %p5412_p13 = scmp.ne.s32.totalorder %s5405_s11, 0 }
  0x84   : > { %4513 = dma.done.wait (%p5412_p13), %s741_s26, 32  }
  0x85   : > { %4515 = vsyncadd (%p5412_p13), %s741_s26, 4294967264  ;;  %s757_s16 = scalar_lea.sflag [#allocation11], %s740_s2 }
  0x86   : > { %4517 = dma.done.wait (%p5412_p13), %s757_s16, 32  }
  0x87   : > { %4519 = vsyncadd (%p5412_p13), %s757_s16, 4294967264  ;;  %s773_s0 = scalar_lea.sflag [#allocation14], %s4842_s3 }
  0x88   : > { %4521 = dma.done.wait (%p5412_p13), %s773_s0, 16  }
  0x89   : > { %4523 = vsyncadd (%p5412_p13), %s773_s0, 4294967280  ;;  %p880_p6 = scmp.lt.s32.totalorder %s4542_s21, 1  ;;  %s5413_s27 = sld [smem:[#allocation29_spill]] }
  0x8a   : > { %s5414_s29 = sld [smem:[#allocation32_spill]]  ;;  %p3694_p1 = scmp.ne.s32.totalorder %s4542_s21, 0 }
  0x8b   : > { %s4864_s18 = scalar_select %p880_p6, %s4542_s21, 1 }
  0x8c   : > { %912 = sbr.rel (%p3694_p1) target bundleno = 352 (0x160), region = 124  ;;  %s5417_s22 = sld [smem:[#allocation27_spill]] (!%p3694_p1) }
  0x8d   : > { %s3780_s20 = sshll.u32 %s4864_s18, 5  ;;  %s895_s24 = scalar_lea.vmem %s5359_s6, %s4864_s18 }
  0x8e   : > { %s4879_s26 = scalar_lea.vmem %s5358_s5, %s3780_s20  ;;  %s4888_s15 = scalar_lea.vmem %s5362_s9, %s3780_s20 }
  0x8f   : > { %s4874_s11 = scalar_lea.vmem %s5413_s27, %s3780_s20  ;;  %s3783_s19 = sshll.u32 %s4864_s18, 6 }
  0x90   : > { %s908_s25 = scalar_lea.vmem %s5367_s14, %s4864_s18  ;;  %s4898_s28 = scalar_lea.vmem %s5414_s29, %s3783_s19 }
  0x91   : > { %v918_v0 = vld [vmem:[#allocation4 + $0x8] sm:$0xff]  ;;  %v917_v1 = vld [vmem:[#allocation4] sm:$0xff]  ;;  %s5415_s20 = sld [smem:[#allocation26_spill]]  ;;  %vm923_vm0 = vcmask 130048   ;;  %vm1021_vm1 = vcmask 261120  }
  0x92   : > { %3895 = vmatprep.subr.mxu0 %v918_v0  ;;  %4092 = vmatprep.subr.mxu1 %v918_v0  ;;  %s5418_s17 = smov %s5417_s22  ;;  %v920_v6 = vld [vmem:[%s5417_s22 + $0x8] sm:$0xff] }
  0x93   : > { %3896 = vmatpush3.msra.mxu0 %v918_v0  ;;  %4094 = vmatpush3.msra.mxu1 %v918_v0  ;;  %v922_v7 = vld [vmem:[%s5418_s17 + $0x18] sm:$0xff]  ;;  %v919_v10 = vld [vmem:[%s5418_s17] sm:$0xff]  ;;  %v921_v11 = vld [vmem:[%s5418_s17 + $0x10] sm:$0xff] }
  0x94   : > { %3897 = vmatprep.subr.mxu0 %v917_v1  ;;  %4093 = vmatprep.subr.mxu1 %v917_v1 }
  0x95   : > { %3898 = vmatpush3.msra.mxu0 %v917_v1  ;;  %4095 = vmatpush3.msra.mxu1 %v917_v1 }
  0x97   : > { %s5416_s2 = smov %s5415_s20  ;;  %v913_v2 = vld [vmem:[%s5415_s20] sm:$0xff] }
  0x98   : > { %v915_v3 = vld [vmem:[%s5416_s2 + $0x10] sm:$0xff]  ;;  %v914_v4 = vld [vmem:[%s5416_s2 + $0x8] sm:$0xff]  ;;  %v916_v5 = vld [vmem:[%s5416_s2 + $0x18] sm:$0xff]  ;;  %3899 = vmatprep.mubr.msk.f32.mxu0 %vm923_vm0, %v913_v2 }
  0x99   : > { %3902 = vmatprep.mubr.msk.f32.mxu1 %vm923_vm0, %v915_v3  ;;  %3900 = vmatmul.mubr.msk.f32.vlgmr.msra.gmra.mxu0 %vm923_vm0, %v914_v4 }
  0x9a   : > { %3903 = vmatmul.mubr.msk.f32.vlgmr.msra.gmra.mxu1 %vm923_vm0, %v916_v5 }
 0x159   : > { %v3901_v8 = vpop.f32.mrf.mxu0 }
 0x15a   : > { %v3904_v9 = vpop.f32.mrf.mxu1  ;;  %v1008_v12 = vadd.f32 %v3901_v8, %v920_v6 }
 0x15b   : > { %v1018_v13 = vadd.f32 %v3904_v9, %v922_v7  ;;  %v1002_v14 = vpop.f32.mrf.mxu0 }
 0x15c   : > { %v1012_v15 = vpop.f32.mrf.mxu1  ;;  %1023 = vst.msk [vmem:[#allocation2 + $0x8] sm:$0xff] %vm1021_vm1, %v1008_v12  ;;  %v1003_v16 = vadd.f32 %v1002_v14, %v919_v10 }
 0x15d   : > { %1025 = vst.msk [vmem:[#allocation2 + $0x18] sm:$0xff] %vm1021_vm1, %v1018_v13  ;;  %v1013_v17 = vadd.f32 %v1012_v15, %v921_v11 }
 0x15e   : > { %1022 = vst.msk [vmem:[#allocation2] sm:$0xff] %vm1021_vm1, %v1003_v16 }
 0x15f   : > { %1024 = vst.msk [vmem:[#allocation2 + $0x10] sm:$0xff] %vm1021_vm1, %v1013_v17 }
 0x160 PF: > { %v1033_v18 = vld [vmem:[%s4874_s11 + $0x18] sm:$0xff]  ;;  %v1032_v19 = vld [vmem:[%s4874_s11 + $0x10] sm:$0xff]  ;;  %vm1041_vm2 = vcmask 261120   ;;  %v1031_v21 = vld [vmem:[%s4874_s11 + $0x8] sm:$0xff]  ;;  %s5419_s27 = scalar_lea.vmem %s5357_s4, %s4864_s18  ;;  %vm1149_vm3 = vcmask 64512   ;;  %s4561_s22 = smov 88   ;;  %v1139_v41 = vlaneseq }
 0x161   : > { %3905 = vmatprep.subr.mxu1 %v1033_v18  ;;  %v1030_v22 = vld [vmem:[%s4874_s11] sm:$0xff]  ;;  %s4560_s11 = smov 96   ;;  %s4562_s20 = smov 120   ;;  %v4565_v45 = vmov -1e+30   ;;  %vm1233_vm5 = vcmask 130048  }
 0x162   : > { %3906 = vmatpush3.msra.mxu1 %v1033_v18  ;;  %v4938_v26 = vld [vmem:[%s5419_s27] ss:$0 sm:$0xff]  ;;  %s4563_s23 = smov 80   ;;  %s4564_s16 = smov 112   ;;  %v1140_v42 = vand.u32 127, %v1139_v41  ;;  %vm1553_vm6 = vcmask 130112  }
 0x163   : > { %3907 = vmatprep.subr.mxu1 %v1032_v19  ;;  %v1027_v23 = vld [vmem:[#allocation2 + $0x8] sm:$0xff]  ;;  %s4566_s29 = smov 64   ;;  %s4567_s0 = smov 56   ;;  %vm1764_vm7 = vcmask 195712   ;;  %vm1975_vm8 = vcmask 261312   ;;  %vm3126_vm9 = vcmask 523264  }
 0x164   : > { %3908 = vmatpush3.msra.mxu1 %v1032_v19  ;;  %v1029_v25 = vld [vmem:[#allocation2 + $0x18] sm:$0xff]  ;;  %vm1141_vm4 = vcmp.lt.s32.totalorder %v1140_v42, 9  ;;  %s4568_s19 = smov 48   ;;  %s4569_s10 = smov 72  }
 0x165   : > { %v1026_v20 = vld [vmem:[#allocation2] sm:$0xff]  ;;  %3909 = vmatprep.subr.mxu1 %v1031_v21  ;;  %v4990_v46 = vsel %vm1141_vm4, 0.0, %v4565_v45  ;;  %s4570_s1 = smov 104   ;;  %s4571_s27 = smov 40  }
 0x166   : > { %3913 = vmatprep.mubr.msk.f32.mxu1 %vm1041_vm2, %v1026_v20  ;;  %3910 = vmatpush3.msra.mxu1 %v1031_v21  ;;  %v1028_v24 = vld [vmem:[#allocation2 + $0x10] sm:$0xff]  ;;  %p3771_p2 = scmp.ne.s32.totalorder %s4542_s21, 1 }
 0x167   : > { %3911 = vmatprep.subr.mxu1 %v1030_v22 }
 0x168   : > { %3912 = vmatpush3.msra.mxu1 %v1030_v22 }
 0x169   : > { %3914 = vmatmul.mubr.msk.f32.vlgmr.msra.gmra.mxu1 %vm1041_vm2, %v1027_v23 }
 0x16a   : > { %3916 = vmatprep.mubr.msk.f32.mxu1 %vm1041_vm2, %v1028_v24 }
 0x16d   : > { %3917 = vmatmul.mubr.msk.f32.gmra.mxu1 %vm1041_vm2, %v1029_v25 }
 0x229   : > { %v3915_v27 = vpop.f32.mrf.mxu1 }
 0x22a   : > { %v4941_v28 = vadd.f32 %v3915_v27, %v4938_v26 }
 0x22b   : > { %v1120_v29 = vpop.f32.mrf.mxu1 }
 0x22c   : > { %v4944_v30 = vadd.f32 %v4938_v26, %v1120_v29  ;;  %1147 = vrot.lane.b32.xlu0 %v4941_v28, %s4560_s11 }
 0x22d   : > { %v4986_v43 = vpop.f32.mrf.mxu1 }
 0x22e   : > { %1145 = vrot.lane.b32.xlu1 %v4944_v30, %s4560_s11  ;;  %3923 = vmatprep.mubr.msk.f32.mxu1 %vm1149_vm3, %v4944_v30 }
 0x22f   : > { %v4988_v44 = vpop.f32.mrf.mxu1 }
 0x230   : > { %1351 = vrot.lane.b32.xlu0 %v4941_v28, %s4561_s22 }
 0x232   : > { %1349 = vrot.lane.b32.xlu1 %v4944_v30, %s4561_s22 }
 0x234   : > { %1345 = vrot.lane.b32.xlu0 %v4944_v30, %s4562_s20 }
 0x236   : > { %1562 = vrot.lane.b32.xlu1 %v4941_v28, %s4563_s23 }
 0x238   : > { %1347 = vrot.lane.b32.xlu0 %v4941_v28, %s4562_s20 }
 0x23a   : > { %1560 = vrot.lane.b32.xlu1 %v4944_v30, %s4563_s23 }
 0x23c   : > { %1556 = vrot.lane.b32.xlu0 %v4944_v30, %s4564_s16 }
 0x23e   : > { %1558 = vrot.lane.b32.xlu1 %v4941_v28, %s4564_s16 }
 0x29e   : > { %v1148_v31 = vpop.permute.xlu0 %1147 }
 0x29f   : > { %3919 = vmatprep.subr.msk.mxu1 %vm1149_vm3, %v1148_v31 }
 0x2a0   : > { %3920 = vmatpush3.xpose.msk.msra.mxu1 %vm1149_vm3, %v1148_v31  ;;  %v1146_v32 = vpop.permute.xlu1 %1145 }
 0x2a1   : > { %3921 = vmatprep.subr.msk.mxu1 %vm1149_vm3, %v1146_v32 }
 0x2a2   : > { %v1352_v33 = vpop.permute.xlu0 %1351 }
 0x2a3   : > { %3933 = vmatprep.subr.msk.mxu0 %vm1149_vm3, %v1352_v33 }
 0x2a4   : > { %3922 = vmatpush3.xpose.msk.msra.mxu1 %vm1149_vm3, %v1146_v32  ;;  %3934 = vmatpush3.xpose.msk.msra.mxu0 %vm1149_vm3, %v1352_v33  ;;  %v1350_v34 = vpop.permute.xlu1 %1349 }
 0x2a5   : > { %3935 = vmatprep.subr.msk.mxu0 %vm1149_vm3, %v1350_v34 }
 0x2a6   : > { %v1346_v35 = vpop.permute.xlu0 %1345 }
 0x2a7   : > { %3924 = vmatmul.mubr.msk.f32.vlgmr.msra.gmra.mxu1 %vm1149_vm3, %v4941_v28  ;;  %3937 = vmatprep.mubr.msk.f32.mxu0 %vm1149_vm3, %v1346_v35 }
 0x2a8   : > { %3936 = vmatpush3.xpose.msk.msra.mxu0 %vm1149_vm3, %v1350_v34  ;;  %v1563_v36 = vpop.permute.xlu1 %1562 }
 0x2a9   : > { %3947 = vmatprep.subr.msk.mxu0 %vm1149_vm3, %v1563_v36 }
 0x2aa   : > { %v1348_v37 = vpop.permute.xlu0 %1347 }
 0x2ab   : > { %3938 = vmatmul.mubr.msk.f32.vlgmr.msra.gmra.mxu0 %vm1149_vm3, %v1348_v37 }
 0x2ac   : > { %3948 = vmatpush3.xpose.msk.msra.mxu0 %vm1149_vm3, %v1563_v36  ;;  %v1561_v38 = vpop.permute.xlu1 %1560 }
 0x2ad   : > { %3949 = vmatprep.subr.msk.mxu0 %vm1149_vm3, %v1561_v38 }
 0x2ae   : > { %v1557_v39 = vpop.permute.xlu0 %1556 }
 0x2af   : > { %3951 = vmatprep.mubr.msk.f32.mxu0 %vm1149_vm3, %v1557_v39 }
 0x2b0   : > { %3950 = vmatpush3.xpose.msk.msra.mxu0 %vm1149_vm3, %v1561_v38  ;;  %v1559_v40 = vpop.permute.xlu1 %1558 }
 0x2b3   : > { %3952 = vmatmul.mubr.msk.f32.vlgmr.msra.gmra.mxu0 %vm1149_vm3, %v1559_v40 }
 0x367   : > { %v3925_v47 = vpop.f32.mrf.mxu1 }
 0x368   : > { %v1230_v48 = vadd.f32 %v3925_v47, %v4990_v46 }
 0x369   : > { %v1224_v49 = vpop.f32.mrf.mxu1 }
 0x36a   : > { %v1225_v50 = vadd.f32 %v1224_v49, %v4990_v46  ;;  %v1237_v51 = vsel %vm1233_vm5, %v1230_v48, -inf }
 0x36b   : > { %v3939_v52 = vpop.f32.mrf.mxu0  ;;  %1238 = vmax.xlane.f32.xlu1 %v1237_v51 }
 0x36c   : > { %v1234_v53 = vsel %vm1233_vm5, %v1225_v50, -inf  ;;  %v1433_v56 = vadd.f32 %v3939_v52, %v4990_v46 }
 0x36d   : > { %v1427_v54 = vpop.f32.mrf.mxu0  ;;  %1235 = vmax.xlane.f32.xlu0 %v1234_v53 }
 0x36e   : > { %v1428_v55 = vadd.f32 %v1427_v54, %v4990_v46  ;;  %v1439_v60 = vsel %vm1233_vm5, %v1433_v56, -inf }
 0x370   : > { %v1436_v57 = vsel %vm1233_vm5, %v1428_v55, -inf }
 0x371   : > { %1437 = vmax.xlane.f32.xlu0 %v1436_v57 }
 0x373   : > { %v3953_v58 = vpop.f32.mrf.mxu0 }
 0x374   : > { %v1644_v59 = vadd.f32 %v3953_v58, %v4990_v46 }
 0x375   : > { %1440 = vmax.xlane.f32.xlu0 %v1439_v60  ;;  %v1638_v62 = vpop.f32.mrf.mxu0 }
 0x376   : > { %v1650_v61 = vsel %vm1233_vm5, %v1644_v59, -inf  ;;  %v1639_v63 = vadd.f32 %v1638_v62, %v4990_v46 }
 0x378   : > { %v1647_v0 = vsel %vm1233_vm5, %v1639_v63, -inf }
 0x379   : > { %1651 = vmax.xlane.f32.xlu0 %v1650_v61 }
 0x37c   : > { %1258 = vrot.lane.b32.xlu1 %v4941_v28, %s4566_s29 }
 0x380   : > { %1460 = vrot.lane.b32.xlu1 %v4941_v28, %s4567_s0 }
 0x384   : > { %1458 = vrot.lane.b32.xlu1 %v4944_v30, %s4567_s0 }
 0x38f   : > { %1256 = vrot.lane.b32.xlu0 %v4944_v30, %s4566_s29 }
 0x393   : > { %1671 = vrot.lane.b32.xlu0 %v4941_v28, %s4568_s19 }
 0x3a8   : > { %1648 = vmax.xlane.f32.xlu1 %v1647_v0 }
 0x3b9   : > { %1669 = vrot.lane.b32.xlu1 %v4944_v30, %s4568_s19 }
 0x3f4   : > { %v1239_v1 = vpop.xlane.xlu1 %1238 }
 0x3f5   : > { %v1241_v2 = vsub.f32 %v1230_v48, %v1239_v1 }
 0x3f6   : > { %v1236_v3 = vpop.xlane.xlu0 %1235 }
 0x3f7   : > { %v1244_v4 = vmul.f32 1.442695, %v1241_v2  ;;  %v1240_v5 = vsub.f32 %v1225_v50, %v1236_v3 }
 0x3f8   : > { %v1259_v6 = vpop.permute.xlu1 %1258 }
 0x3f9   : > { %4208 = vpow2.f32 %v1244_v4  ;;  %v1242_v7 = vmul.f32 1.442695, %v1240_v5  ;;  %3926 = vmatprep.subr.mxu1 %v1259_v6 }
 0x3fa   : > { %3927 = vmatpush3.msra.mxu1 %v1259_v6  ;;  %v1438_v8 = vpop.xlane.xlu0 %1437 }
 0x3fb   : > { %4210 = vpow2.f32 %v1242_v7  ;;  %v1442_v9 = vsub.f32 %v1428_v55, %v1438_v8 }
 0x3fc   : > { %v1461_v21 = vpop.permute.xlu1 %1460 }
 0x3fd   : > { %v1444_v10 = vmul.f32 1.442695, %v1442_v9 }
 0x3fe   : > { %v1441_v11 = vpop.xlane.xlu0 %1440 }
 0x3ff   : > { %4212 = vpow2.f32 %v1444_v10  ;;  %v1443_v12 = vsub.f32 %v1433_v56, %v1441_v11 }
 0x400   : > { %v1459_v32 = vpop.permute.xlu1 %1458 }
 0x401   : > { %v1446_v13 = vmul.f32 1.442695, %v1443_v12 }
 0x402   : > { %v1652_v14 = vpop.xlane.xlu0 %1651 }
 0x403   : > { %4214 = vpow2.f32 %v1446_v13  ;;  %v1654_v15 = vsub.f32 %v1644_v59, %v1652_v14  ;;  %v5060_v13 = vadd.f32 %v4986_v43, %v4938_v26  ;;  %v5066_v14 = vadd.f32 %v4938_v26, %v4988_v44 }
 0x405   : > { %v1657_v16 = vmul.f32 1.442695, %v1654_v15 }
 0x406   : > { %v4209_v17 = vpop.eup %4208  ;;  %v1257_v18 = vpop.permute.xlu0 %1256 }
 0x407   : > { %4216 = vpow2.f32 %v1657_v16  ;;  %3928 = vmatprep.subr.mxu1 %v1257_v18  ;;  %v1249_v19 = vsel %vm1233_vm5, %v4209_v17, 0.0 }
 0x408   : > { %v4211_v20 = vpop.eup %4210  ;;  %1250 = vadd.xlane.f32.xlu0 %v1249_v19  ;;  %3929 = vmatpush3.msra.mxu1 %v1257_v18 }
 0x409   : > { %3940 = vmatprep.subr.mxu1 %v1461_v21  ;;  %v1246_v22 = vsel %vm1233_vm5, %v4211_v20, 0.0 }
 0x40a   : > { %1247 = vadd.xlane.f32.xlu1 %v1246_v22  ;;  %v1672_v38 = vpop.permute.xlu0 %1671 }
 0x40c   : > { %v4213_v23 = vpop.eup %4212 }
 0x40d   : > { %v1448_v24 = vsel %vm1233_vm5, %v4213_v23, 0.0 }
 0x40e   : > { %1449 = vadd.xlane.f32.xlu1 %v1448_v24 }
 0x410   : > { %v4215_v25 = vpop.eup %4214 }
 0x411   : > { %v1451_v27 = vsel %vm1233_vm5, %v4215_v25, 0.0 }
 0x412   : > { %1452 = vadd.xlane.f32.xlu0 %v1451_v27 }
 0x414   : > { %v4217_v29 = vpop.eup %4216 }
 0x415   : > { %v1662_v31 = vsel %vm1233_vm5, %v4217_v29, 0.0 }
 0x416   : > { %1663 = vadd.xlane.f32.xlu0 %v1662_v31 }
 0x41f   : > { %1771 = vrot.lane.b32.xlu1 %v4944_v30, %s4569_s10 }
 0x42c   : > { %1773 = vrot.lane.b32.xlu0 %v4941_v28, %s4569_s10 }
 0x430   : > { %1767 = vrot.lane.b32.xlu0 %v4944_v30, %s4570_s1 }
 0x431   : > { %v1649_v33 = vpop.xlane.xlu1 %1648 }
 0x432   : > { %v1653_v34 = vsub.f32 %v1639_v63, %v1649_v33 }
 0x434   : > { %v1655_v35 = vmul.f32 1.442695, %v1653_v34 }
 0x435   : > { %v1670_v39 = vpop.permute.xlu1 %1669 }
 0x436   : > { %4218 = vpow2.f32 %v1655_v35 }
 0x443   : > { %v4219_v36 = vpop.eup %4218 }
 0x444   : > { %v1659_v37 = vsel %vm1233_vm5, %v4219_v36, 0.0 }
 0x445   : > { %1660 = vadd.xlane.f32.xlu1 %v1659_v37 }
 0x456   : > { %1769 = vrot.lane.b32.xlu1 %v4941_v28, %s4570_s1 }
 0x491   : > { %v1251_v40 = vpop.xlane.xlu0 %1250 }
 0x492   : > { %4220 = vrcp.f32 %v1251_v40 }
 0x493   : > { %v1248_v41 = vpop.xlane.xlu1 %1247 }
 0x494   : > { %4222 = vrcp.f32 %v1248_v41 }
 0x497   : > { %v1450_v42 = vpop.xlane.xlu1 %1449 }
 0x498   : > { %4224 = vrcp.f32 %v1450_v42 }
 0x49b   : > { %v1453_v45 = vpop.xlane.xlu0 %1452  ;;  %v1772_v57 = vpop.permute.xlu1 %1771 }
 0x49c   : > { %4226 = vrcp.f32 %v1453_v45 }
 0x49f   : > { %v4221_v47 = vpop.eup %4220  ;;  %v1664_v54 = vpop.xlane.xlu0 %1663 }
 0x4a0   : > { %v1255_v50 = vmul.f32 %v4221_v47, %v4209_v17  ;;  %4228 = vrcp.f32 %v1664_v54 }
 0x4a1   : > { %v4223_v48 = vpop.eup %4222 }
 0x4a2   : > { %v1254_v49 = vmul.f32 %v4223_v48, %v4211_v20 }
 0x4a3   : > { %v1774_v56 = vpop.permute.xlu0 %1773 }
 0x4a4   : > { %3930 = vmatprep.mubr.msk.f32.mxu1 %vm1233_vm5, %v1254_v49 }
 0x4a5   : > { %v4225_v51 = vpop.eup %4224  ;;  %3931 = vmatmul.mubr.msk.f32.vlgmr.msra.gmra.mxu1 %vm1233_vm5, %v1255_v50 }
 0x4a6   : > { %3941 = vmatpush3.msra.mxu1 %v1461_v21  ;;  %v1456_v52 = vmul.f32 %v4225_v51, %v4213_v23 }
 0x4a7   : > { %3942 = vmatprep.subr.mxu1 %v1459_v32  ;;  %v1768_v63 = vpop.permute.xlu0 %1767 }
 0x4a8   : > { %3943 = vmatpush3.msra.mxu1 %v1459_v32  ;;  %3944 = vmatprep.mubr.msk.f32.mxu1 %vm1233_vm5, %v1456_v52 }
 0x4a9   : > { %v4227_v53 = vpop.eup %4226  ;;  %3954 = vmatprep.subr.mxu1 %v1672_v38 }
 0x4aa   : > { %v1457_v55 = vmul.f32 %v4227_v53, %v4215_v25 }
 0x4ac   : > { %3945 = vmatmul.mubr.msk.f32.vlgmr.msra.gmra.mxu1 %vm1233_vm5, %v1457_v55 }
 0x4ad   : > { %3955 = vmatpush3.msra.mxu1 %v1672_v38  ;;  %v4229_v59 = vpop.eup %4228 }
 0x4ae   : > { %3956 = vmatprep.subr.mxu1 %v1670_v39  ;;  %v1668_v62 = vmul.f32 %v4229_v59, %v4217_v29 }
 0x4af   : > { %3957 = vmatpush3.msra.mxu1 %v1670_v39 }
 0x4b0   : > { %3961 = vmatprep.subr.msk.mxu1 %vm1149_vm3, %v1774_v56 }
 0x4ce   : > { %v1661_v58 = vpop.xlane.xlu1 %1660 }
 0x4cf   : > { %4230 = vrcp.f32 %v1661_v58 }
 0x4d2   : > { %v1770_v0 = vpop.permute.xlu1 %1769 }
 0x4dc   : > { %v4231_v60 = vpop.eup %4230 }
 0x4dd   : > { %v1667_v61 = vmul.f32 %v4231_v60, %v4219_v36 }
 0x4df   : > { %3958 = vmatprep.mubr.msk.f32.mxu1 %vm1233_vm5, %v1667_v61 }
 0x4e0   : > { %3959 = vmatmul.mubr.msk.f32.vlgmr.msra.gmra.mxu1 %vm1233_vm5, %v1668_v62 }
 0x4e1   : > { %3962 = vmatpush3.xpose.msk.msra.mxu1 %vm1149_vm3, %v1774_v56  ;;  %3965 = vmatprep.mubr.msk.f32.mxu1 %vm1149_vm3, %v1768_v63 }
 0x4e2   : > { %3963 = vmatprep.subr.msk.mxu1 %vm1149_vm3, %v1772_v57 }
 0x4e5   : > { %3964 = vmatpush3.xpose.msk.msra.mxu1 %vm1149_vm3, %v1772_v57 }
 0x4e8   : > { %3966 = vmatmul.mubr.msk.f32.vlgmr.msra.gmra.mxu1 %vm1149_vm3, %v1770_v0 }
 0x565   : > { %v3932_v1 = vpop.f32.mrf.mxu1 }
 0x566   : > { %1344 = vst.msk [vmem:[#allocation3 + $0x8] sm:$0xff] %vm1149_vm3, %v3932_v1 }
 0x567   : > { %v1334_v2 = vpop.f32.mrf.mxu1 }
 0x568   : > { %1343 = vst.msk [vmem:[#allocation3] sm:$0xff] %vm1149_vm3, %v1334_v2 }
 0x56c   : > { %v5044_v3 = vpop.f32.mrf.mxu1 }
 0x56e   : > { %v5046_v4 = vpop.f32.mrf.mxu1 }
 0x5a0   : > { %v5048_v5 = vpop.f32.mrf.mxu1 }
 0x5a2   : > { %v5050_v6 = vpop.f32.mrf.mxu1 }
 0x5a8   : > { %v3967_v7 = vpop.f32.mrf.mxu1 }
 0x5a9   : > { %v1855_v8 = vadd.f32 %v3967_v7, %v4990_v46 }
 0x5aa   : > { %v1849_v9 = vpop.f32.mrf.mxu1 }
 0x5ab   : > { %v1850_v10 = vadd.f32 %v1849_v9, %v4990_v46  ;;  %v1861_v11 = vsel %vm1233_vm5, %v1855_v8, -inf }
 0x5ac   : > { %1862 = vmax.xlane.f32.xlu1 %v1861_v11 }
 0x5ad   : > { %v1858_v12 = vsel %vm1233_vm5, %v1850_v10, -inf }
 0x5ae   : > { %1859 = vmax.xlane.f32.xlu0 %v1858_v12 }
 0x5bd   : > { %1882 = vrot.lane.b32.xlu1 %v4941_v28, %s4571_s27 }
 0x5c1   : > { %1982 = vrot.lane.b32.xlu1 %v5060_v13, %s4560_s11 }
 0x5c5   : > { %1980 = vrot.lane.b32.xlu1 %v5066_v14, %s4560_s11  ;;  %s4572_s11 = smov 8  }
 0x635   : > { %v1863_v15 = vpop.xlane.xlu1 %1862 }
 0x636   : > { %v1865_v16 = vsub.f32 %v1855_v8, %v1863_v15 }
 0x637   : > { %v1860_v17 = vpop.xlane.xlu0 %1859 }
 0x638   : > { %v1868_v18 = vmul.f32 1.442695, %v1865_v16  ;;  %v1864_v19 = vsub.f32 %v1850_v10, %v1860_v17 }
 0x639   : > { %v1883_v28 = vpop.permute.xlu1 %1882 }
 0x63a   : > { %4232 = vpow2.f32 %v1868_v18  ;;  %v1866_v20 = vmul.f32 1.442695, %v1864_v19  ;;  %3968 = vmatprep.subr.mxu0 %v1883_v28 }
 0x63b   : > { %3969 = vmatpush3.msra.mxu0 %v1883_v28 }
 0x63c   : > { %4234 = vpow2.f32 %v1866_v20 }
 0x63d   : > { %v1983_v25 = vpop.permute.xlu1 %1982 }
 0x641   : > { %v1981_v33 = vpop.permute.xlu1 %1980 }
 0x647   : > { %v4233_v43 = vpop.eup %4232 }
 0x648   : > { %v1873_v21 = vsel %vm1233_vm5, %v4233_v43, 0.0 }
 0x649   : > { %v4235_v22 = vpop.eup %4234  ;;  %1874 = vadd.xlane.f32.xlu0 %v1873_v21 }
 0x64a   : > { %v1870_v26 = vsel %vm1233_vm5, %v4235_v22, 0.0 }
 0x64d   : > { %1871 = vadd.xlane.f32.xlu0 %v1870_v26 }
 0x663   : > { %1880 = vrot.lane.b32.xlu0 %v4944_v30, %s4571_s27 }
 0x6d2   : > { %v1875_v44 = vpop.xlane.xlu0 %1874 }
 0x6d3   : > { %4236 = vrcp.f32 %v1875_v44 }
 0x6d6   : > { %v1872_v23 = vpop.xlane.xlu0 %1871 }
 0x6d7   : > { %4238 = vrcp.f32 %v1872_v23 }
 0x6da   : > { %v1881_v24 = vpop.permute.xlu0 %1880 }
 0x6db   : > { %3970 = vmatprep.subr.mxu0 %v1881_v24 }
 0x6dc   : > { %3971 = vmatpush3.msra.mxu0 %v1881_v24 }
 0x6dd   : > { %3975 = vmatprep.subr.msk.mxu0 %vm1149_vm3, %v1983_v25 }
 0x6e0   : > { %v4237_v27 = vpop.eup %4236 }
 0x6e1   : > { %v1879_v32 = vmul.f32 %v4237_v27, %v4233_v43 }
 0x6e4   : > { %v4239_v29 = vpop.eup %4238 }
 0x6e5   : > { %v1878_v31 = vmul.f32 %v4239_v29, %v4235_v22 }
 0x6e7   : > { %3972 = vmatprep.mubr.msk.f32.mxu0 %vm1233_vm5, %v1878_v31 }
 0x6e8   : > { %3973 = vmatmul.mubr.msk.f32.vlgmr.msra.gmra.mxu0 %vm1233_vm5, %v1879_v32 }
 0x6e9   : > { %3976 = vmatpush3.xpose.msk.msra.mxu0 %vm1149_vm3, %v1983_v25  ;;  %3979 = vmatprep.mubr.msk.f32.mxu0 %vm1149_vm3, %v5066_v14 }
 0x6ea   : > { %3977 = vmatprep.subr.msk.mxu0 %vm1149_vm3, %v1981_v33 }
 0x6ed   : > { %3978 = vmatpush3.xpose.msk.msra.mxu0 %vm1149_vm3, %v1981_v33 }
 0x6f0   : > { %3980 = vmatmul.mubr.msk.f32.vlgmr.msra.gmra.mxu0 %vm1149_vm3, %v5060_v13 }
 0x7a8   : > { %v5084_v30 = vpop.f32.mrf.mxu0 }
 0x7aa   : > { %v5086_v34 = vpop.f32.mrf.mxu0 }
 0x7b0   : > { %v3981_v35 = vpop.f32.mrf.mxu0 }
 0x7b1   : > { %v2064_v36 = vadd.f32 %v3981_v35, %v4990_v46 }
 0x7b2   : > { %v2058_v37 = vpop.f32.mrf.mxu0 }
 0x7b3   : > { %v2059_v38 = vadd.f32 %v2058_v37, %v4990_v46  ;;  %v2070_v39 = vsel %vm1233_vm5, %v2064_v36, -inf }
 0x7b4   : > { %2071 = vmax.xlane.f32.xlu1 %v2070_v39 }
 0x7b5   : > { %v2067_v40 = vsel %vm1233_vm5, %v2059_v38, -inf }
 0x7b6   : > { %2068 = vmax.xlane.f32.xlu0 %v2067_v40 }
 0x7c5   : > { %2091 = vrot.lane.b32.xlu1 %v5060_v13, %s4566_s29 }
 0x7c9   : > { %2184 = vrot.lane.b32.xlu1 %v5060_v13, %s4561_s22 }
 0x7cd   : > { %2182 = vrot.lane.b32.xlu1 %v5066_v14, %s4561_s22  ;;  %s4573_s22 = smov 16  }
 0x7d1   : > { %2180 = vrot.lane.b32.xlu1 %v5060_v13, %s4562_s20 }
 0x83d   : > { %v2072_v41 = vpop.xlane.xlu1 %2071 }
 0x83e   : > { %v2074_v42 = vsub.f32 %v2064_v36, %v2072_v41 }
 0x83f   : > { %v2069_v45 = vpop.xlane.xlu0 %2068 }
 0x840   : > { %v2077_v47 = vmul.f32 1.442695, %v2074_v42  ;;  %v2073_v48 = vsub.f32 %v2059_v38, %v2069_v45 }
 0x841   : > { %v2092_v49 = vpop.permute.xlu1 %2091 }
 0x842   : > { %4240 = vpow2.f32 %v2077_v47  ;;  %v2075_v50 = vmul.f32 1.442695, %v2073_v48  ;;  %3982 = vmatprep.subr.mxu1 %v2092_v49 }
 0x843   : > { %3983 = vmatpush3.msra.mxu1 %v2092_v49 }
 0x844   : > { %4242 = vpow2.f32 %v2075_v50 }
 0x845   : > { %v2185_v58 = vpop.permute.xlu1 %2184 }
 0x849   : > { %v2183_v0 = vpop.permute.xlu1 %2182 }
 0x84d   : > { %v2181_v1 = vpop.permute.xlu1 %2180 }
 0x84f   : > { %v4241_v51 = vpop.eup %4240 }
 0x850   : > { %v2082_v52 = vsel %vm1233_vm5, %v4241_v51, 0.0 }
 0x851   : > { %v4243_v53 = vpop.eup %4242  ;;  %2083 = vadd.xlane.f32.xlu0 %v2082_v52 }
 0x852   : > { %v2079_v54 = vsel %vm1233_vm5, %v4243_v53, 0.0 }
 0x855   : > { %2080 = vadd.xlane.f32.xlu0 %v2079_v54 }
 0x86b   : > { %2089 = vrot.lane.b32.xlu0 %v5066_v14, %s4566_s29  ;;  %s5424_s29 = scalar_lea.vmem [#allocation13], %s4842_s3 }
 0x86f   : > { %2178 = vrot.lane.b32.xlu0 %v5066_v14, %s4562_s20  ;;  %s4574_s20 = smov 24  }
 0x8da   : > { %v2084_v55 = vpop.xlane.xlu0 %2083 }
 0x8db   : > { %4244 = vrcp.f32 %v2084_v55 }
 0x8de   : > { %v2081_v56 = vpop.xlane.xlu0 %2080 }
 0x8df   : > { %4246 = vrcp.f32 %v2081_v56 }
 0x8e2   : > { %v2090_v57 = vpop.permute.xlu0 %2089 }
 0x8e3   : > { %3984 = vmatprep.subr.mxu1 %v2090_v57 }
 0x8e4   : > { %3985 = vmatpush3.msra.mxu1 %v2090_v57 }
 0x8e5   : > { %3989 = vmatprep.subr.msk.mxu1 %vm1149_vm3, %v2185_v58 }
 0x8e6   : > { %v2179_v63 = vpop.permute.xlu0 %2178 }
 0x8e8   : > { %v4245_v59 = vpop.eup %4244 }
 0x8e9   : > { %v2088_v62 = vmul.f32 %v4245_v59, %v4241_v51 }
 0x8ec   : > { %v4247_v60 = vpop.eup %4246 }
 0x8ed   : > { %v2087_v61 = vmul.f32 %v4247_v60, %v4243_v53 }
 0x8ef   : > { %3986 = vmatprep.mubr.msk.f32.mxu1 %vm1233_vm5, %v2087_v61 }
 0x8f0   : > { %3987 = vmatmul.mubr.msk.f32.vlgmr.msra.gmra.mxu1 %vm1233_vm5, %v2088_v62 }
 0x8f1   : > { %3990 = vmatpush3.xpose.msk.msra.mxu1 %vm1149_vm3, %v2185_v58  ;;  %3993 = vmatprep.mubr.msk.f32.mxu1 %vm1149_vm3, %v2179_v63 }
 0x8f2   : > { %3991 = vmatprep.subr.msk.mxu1 %vm1149_vm3, %v2183_v0 }
 0x8f5   : > { %3992 = vmatpush3.xpose.msk.msra.mxu1 %vm1149_vm3, %v2183_v0 }
 0x8f8   : > { %3994 = vmatmul.mubr.msk.f32.vlgmr.msra.gmra.mxu1 %vm1149_vm3, %v2181_v1 }
 0x9b0   : > { %v3988_v2 = vpop.f32.mrf.mxu1 }
 0x9b1   : > { %2177 = vst.msk [vmem:[#allocation3 + $0x18] sm:$0xff] %vm1149_vm3, %v3988_v2 }
 0x9b2   : > { %v2167_v7 = vpop.f32.mrf.mxu1 }
 0x9b3   : > { %2176 = vst.msk [vmem:[#allocation3 + $0x10] sm:$0xff] %vm1149_vm3, %v2167_v7 }
 0x9b8   : > { %v3995_v8 = vpop.f32.mrf.mxu1 }
 0x9b9   : > { %v2266_v9 = vadd.f32 %v3995_v8, %v4990_v46 }
 0x9ba   : > { %v2260_v10 = vpop.f32.mrf.mxu1 }
 0x9bb   : > { %v2261_v11 = vadd.f32 %v2260_v10, %v4990_v46  ;;  %v2272_v12 = vsel %vm1233_vm5, %v2266_v9, -inf }
 0x9bc   : > { %2273 = vmax.xlane.f32.xlu1 %v2272_v12 }
 0x9bd   : > { %v2269_v15 = vsel %vm1233_vm5, %v2261_v11, -inf }
 0x9be   : > { %2270 = vmax.xlane.f32.xlu0 %v2269_v15 }
 0x9cd   : > { %2293 = vrot.lane.b32.xlu1 %v5060_v13, %s4567_s0 }
 0x9d1   : > { %2394 = vrot.lane.b32.xlu1 %v5060_v13, %s4563_s23 }
 0x9d5   : > { %2392 = vrot.lane.b32.xlu1 %v5066_v14, %s4563_s23 }
 0x9d9   : > { %2390 = vrot.lane.b32.xlu1 %v5060_v13, %s4564_s16 }
 0xa45   : > { %v2274_v16 = vpop.xlane.xlu1 %2273 }
 0xa46   : > { %v2276_v17 = vsub.f32 %v2266_v9, %v2274_v16 }
 0xa47   : > { %v2271_v18 = vpop.xlane.xlu0 %2270 }
 0xa48   : > { %v2279_v19 = vmul.f32 1.442695, %v2276_v17  ;;  %v2275_v28 = vsub.f32 %v2261_v11, %v2271_v18 }
 0xa49   : > { %v2294_v20 = vpop.permute.xlu1 %2293 }
 0xa4a   : > { %4248 = vpow2.f32 %v2279_v19  ;;  %v2277_v43 = vmul.f32 1.442695, %v2275_v28  ;;  %3996 = vmatprep.subr.mxu0 %v2294_v20 }
 0xa4b   : > { %3997 = vmatpush3.msra.mxu0 %v2294_v20 }
 0xa4c   : > { %4250 = vpow2.f32 %v2277_v43 }
 0xa4d   : > { %v2395_v27 = vpop.permute.xlu1 %2394 }
 0xa51   : > { %v2393_v36 = vpop.permute.xlu1 %2392 }
 0xa55   : > { %v2391_v37 = vpop.permute.xlu1 %2390 }
 0xa57   : > { %v4249_v21 = vpop.eup %4248 }
 0xa58   : > { %v2284_v22 = vsel %vm1233_vm5, %v4249_v21, 0.0 }
 0xa59   : > { %v4251_v26 = vpop.eup %4250  ;;  %2285 = vadd.xlane.f32.xlu0 %v2284_v22 }
 0xa5a   : > { %v2281_v44 = vsel %vm1233_vm5, %v4251_v26, 0.0 }
 0xa5d   : > { %2282 = vadd.xlane.f32.xlu0 %v2281_v44 }
 0xa73   : > { %2291 = vrot.lane.b32.xlu0 %v5066_v14, %s4567_s0  ;;  %s5428_s0 = sld [smem:[#allocation36_spill]] (!%p3771_p2) }
 0xa77   : > { %2388 = vrot.lane.b32.xlu0 %v5066_v14, %s4564_s16  ;;  %s5426_s16 = sld [smem:[#allocation33_spill]] (!%p3771_p2) }
 0xae2   : > { %v2286_v23 = vpop.xlane.xlu0 %2285 }
 0xae3   : > { %4252 = vrcp.f32 %v2286_v23 }
 0xae6   : > { %v2283_v24 = vpop.xlane.xlu0 %2282 }
 0xae7   : > { %4254 = vrcp.f32 %v2283_v24 }
 0xaea   : > { %v2292_v25 = vpop.permute.xlu0 %2291 }
 0xaeb   : > { %3998 = vmatprep.subr.mxu0 %v2292_v25 }
 0xaec   : > { %3999 = vmatpush3.msra.mxu0 %v2292_v25 }
 0xaed   : > { %4003 = vmatprep.subr.msk.mxu0 %vm1149_vm3, %v2395_v27 }
 0xaee   : > { %v2389_v35 = vpop.permute.xlu0 %2388 }
 0xaf0   : > { %v4253_v29 = vpop.eup %4252 }
 0xaf1   : > { %v2290_v33 = vmul.f32 %v4253_v29, %v4249_v21 }
 0xaf4   : > { %v4255_v31 = vpop.eup %4254 }
 0xaf5   : > { %v2289_v32 = vmul.f32 %v4255_v31, %v4251_v26 }
 0xaf7   : > { %4000 = vmatprep.mubr.msk.f32.mxu0 %vm1233_vm5, %v2289_v32 }
 0xaf8   : > { %4001 = vmatmul.mubr.msk.f32.vlgmr.msra.gmra.mxu0 %vm1233_vm5, %v2290_v33 }
 0xaf9   : > { %4004 = vmatpush3.xpose.msk.msra.mxu0 %vm1149_vm3, %v2395_v27  ;;  %4007 = vmatprep.mubr.msk.f32.mxu0 %vm1149_vm3, %v2389_v35  ;;  %v2815_v35 = vld [vmem:[%s4879_s26 + $0x18] sm:$0xff] }
 0xafa   : > { %4005 = vmatprep.subr.msk.mxu0 %vm1149_vm3, %v2393_v36 }
 0xafd   : > { %4006 = vmatpush3.xpose.msk.msra.mxu0 %vm1149_vm3, %v2393_v36 }
 0xb00   : > { %4008 = vmatmul.mubr.msk.f32.vlgmr.msra.gmra.mxu0 %vm1149_vm3, %v2391_v37 }
 0xbb8   : > { %v5142_v38 = vpop.f32.mrf.mxu0 }
 0xbba   : > { %v5144_v39 = vpop.f32.mrf.mxu0 }
 0xbc0   : > { %v4009_v40 = vpop.f32.mrf.mxu0 }
 0xbc1   : > { %v2476_v41 = vadd.f32 %v4009_v40, %v4990_v46  ;;  %v2814_v40 = vld [vmem:[%s4879_s26 + $0x10] sm:$0xff] }
 0xbc2   : > { %v2470_v42 = vpop.f32.mrf.mxu0 }
 0xbc3   : > { %v2471_v45 = vadd.f32 %v2470_v42, %v4990_v46  ;;  %v2482_v47 = vsel %vm1233_vm5, %v2476_v41, -inf }
 0xbc4   : > { %2483 = vmax.xlane.f32.xlu1 %v2482_v47  ;;  %v2812_v47 = vld [vmem:[%s4879_s26] sm:$0xff] }
 0xbc5   : > { %v2479_v48 = vsel %vm1233_vm5, %v2471_v45, -inf }
 0xbc6   : > { %2480 = vmax.xlane.f32.xlu0 %v2479_v48 }
 0xbd5   : > { %2503 = vrot.lane.b32.xlu1 %v5060_v13, %s4568_s19 }
 0xbd9   : > { %2604 = vrot.lane.b32.xlu1 %v5060_v13, %s4569_s10 }
 0xbdd   : > { %2602 = vrot.lane.b32.xlu1 %v5066_v14, %s4569_s10 }
 0xbe1   : > { %2600 = vrot.lane.b32.xlu1 %v5060_v13, %s4570_s1 }
 0xc4d   : > { %v2484_v49 = vpop.xlane.xlu1 %2483 }
 0xc4e   : > { %v2486_v50 = vsub.f32 %v2476_v41, %v2484_v49  ;;  %v2813_v41 = vld [vmem:[%s4879_s26 + $0x8] sm:$0xff]  ;;  %s5421_s26 = scalar_lea.vmem [#allocation9], %s4842_s3 }
 0xc4f   : > { %v2481_v51 = vpop.xlane.xlu0 %2480 }
 0xc50   : > { %v2489_v52 = vmul.f32 1.442695, %v2486_v50  ;;  %v2485_v53 = vsub.f32 %v2471_v45, %v2481_v51 }
 0xc51   : > { %v2504_v54 = vpop.permute.xlu1 %2503 }
 0xc52   : > { %4256 = vpow2.f32 %v2489_v52  ;;  %v2487_v55 = vmul.f32 1.442695, %v2485_v53  ;;  %4010 = vmatprep.subr.mxu1 %v2504_v54  ;;  %v3752_v53 = vld [vmem:[%s895_s24] ss:$0 sm:$0xff]  ;;  %s5420_s24 = scalar_lea.vmem [#allocation7], %s4842_s3 }
 0xc53   : > { %4011 = vmatpush3.msra.mxu1 %v2504_v54 }
 0xc54   : > { %4258 = vpow2.f32 %v2487_v55 }
 0xc55   : > { %v2605_v63 = vpop.permute.xlu1 %2604 }
 0xc59   : > { %v2603_v9 = vpop.permute.xlu1 %2602 }
 0xc5d   : > { %v2601_v10 = vpop.permute.xlu1 %2600 }
 0xc5f   : > { %v4257_v56 = vpop.eup %4256 }
 0xc60   : > { %v2494_v57 = vsel %vm1233_vm5, %v4257_v56, 0.0 }
 0xc61   : > { %v4259_v58 = vpop.eup %4258  ;;  %2495 = vadd.xlane.f32.xlu0 %v2494_v57 }
 0xc62   : > { %v2491_v59 = vsel %vm1233_vm5, %v4259_v58, 0.0 }
 0xc65   : > { %2492 = vadd.xlane.f32.xlu0 %v2491_v59 }
 0xc7b   : > { %2501 = vrot.lane.b32.xlu0 %v5066_v14, %s4568_s19 }
 0xc7f   : > { %2598 = vrot.lane.b32.xlu0 %v5066_v14, %s4570_s1 }
 0xcea   : > { %v2496_v60 = vpop.xlane.xlu0 %2495 }
 0xceb   : > { %4260 = vrcp.f32 %v2496_v60 }
 0xcee   : > { %v2493_v61 = vpop.xlane.xlu0 %2492 }
 0xcef   : > { %4262 = vrcp.f32 %v2493_v61 }
 0xcf2   : > { %v2502_v62 = vpop.permute.xlu0 %2501 }
 0xcf3   : > { %4012 = vmatprep.subr.mxu1 %v2502_v62 }
 0xcf4   : > { %4013 = vmatpush3.msra.mxu1 %v2502_v62 }
 0xcf5   : > { %4017 = vmatprep.subr.msk.mxu1 %vm1149_vm3, %v2605_v63 }
 0xcf6   : > { %v2599_v8 = vpop.permute.xlu0 %2598 }
 0xcf8   : > { %v4261_v0 = vpop.eup %4260 }
 0xcf9   : > { %v2500_v7 = vmul.f32 %v4261_v0, %v4257_v56  ;;  %v4288_v56 = vld [vmem:[#allocation2] sm:$0xff] }
 0xcfc   : > { %v4263_v1 = vpop.eup %4262 }
 0xcfd   : > { %v2499_v2 = vmul.f32 %v4263_v1, %v4259_v58  ;;  %v4289_v58 = vld [vmem:[#allocation2 + $0x8] sm:$0xff] }
 0xcff   : > { %4014 = vmatprep.mubr.msk.f32.mxu1 %vm1233_vm5, %v2499_v2 }
 0xd00   : > { %4015 = vmatmul.mubr.msk.f32.vlgmr.msra.gmra.mxu1 %vm1233_vm5, %v2500_v7 }
 0xd01   : > { %4018 = vmatpush3.xpose.msk.msra.mxu1 %vm1149_vm3, %v2605_v63  ;;  %4021 = vmatprep.mubr.msk.f32.mxu1 %vm1149_vm3, %v2599_v8 }
 0xd02   : > { %4019 = vmatprep.subr.msk.mxu1 %vm1149_vm3, %v2603_v9 }
 0xd05   : > { %4020 = vmatpush3.xpose.msk.msra.mxu1 %vm1149_vm3, %v2603_v9 }
 0xd08   : > { %4022 = vmatmul.mubr.msk.f32.vlgmr.msra.gmra.mxu1 %vm1149_vm3, %v2601_v10 }
 0xdc0   : > { %v4016_v11 = vpop.f32.mrf.mxu1 }
 0xdc2   : > { %v2579_v12 = vpop.f32.mrf.mxu1 }
 0xdc8   : > { %v4023_v15 = vpop.f32.mrf.mxu1 }
 0xdc9   : > { %v2686_v16 = vadd.f32 %v4023_v15, %v4990_v46 }
 0xdca   : > { %v2680_v17 = vpop.f32.mrf.mxu1 }
 0xdcb   : > { %v2681_v18 = vadd.f32 %v2680_v17, %v4990_v46  ;;  %v2692_v19 = vsel %vm1233_vm5, %v2686_v16, -inf }
 0xdcc   : > { %2693 = vmax.xlane.f32.xlu1 %v2692_v19 }
 0xdcd   : > { %v2689_v28 = vsel %vm1233_vm5, %v2681_v18, -inf }
 0xdce   : > { %2690 = vmax.xlane.f32.xlu0 %v2689_v28 }
 0xddd   : > { %2713 = vrot.lane.b32.xlu1 %v5060_v13, %s4571_s27 }
 0xde1   : > { %1547 = vrot.lane.b32.xlu1 %v5046_v4, %s4572_s11 }
 0xde5   : > { %1549 = vrot.lane.b32.xlu1 %v5044_v3, %s4572_s11 }
 0xde9   : > { %1760 = vrot.lane.b32.xlu1 %v5048_v5, %s4573_s22 }
 0xded   : > { %1971 = vrot.lane.b32.xlu1 %v5084_v30, %s4574_s20 }
 0xdf1   : > { %2382 = vrot.lane.b32.xlu1 %v5142_v38, %s4572_s11 }
 0xdf5   : > { %2592 = vrot.lane.b32.xlu1 %v4016_v11, %s4573_s22 }
 0xe55   : > { %v2694_v46 = vpop.xlane.xlu1 %2693 }
 0xe56   : > { %v2696_v13 = vsub.f32 %v2686_v16, %v2694_v46 }
 0xe57   : > { %v2691_v20 = vpop.xlane.xlu0 %2690 }
 0xe58   : > { %v2699_v4 = vmul.f32 1.442695, %v2696_v13  ;;  %v2695_v43 = vsub.f32 %v2681_v18, %v2691_v20  ;;  %v4290_v13 = vld [vmem:[#allocation2 + $0x10] sm:$0xff] }
 0xe59   : > { %v2714_v21 = vpop.permute.xlu1 %2713 }
 0xe5a   : > { %4264 = vpow2.f32 %v2699_v4  ;;  %v2697_v3 = vmul.f32 1.442695, %v2695_v43  ;;  %4024 = vmatprep.subr.mxu0 %v2714_v21 }
 0xe5b   : > { %4025 = vmatpush3.msra.mxu0 %v2714_v21  ;;  %v4291_v21 = vld [vmem:[#allocation2 + $0x18] sm:$0xff] }
 0xe5c   : > { %4266 = vpow2.f32 %v2697_v3 }
 0xe5d   : > { %v1548_v5 = vpop.permute.xlu1 %1547 }
 0xe5e   : > { %1554 = vst.msk [vmem:[#allocation3] sm:$0xff] %vm1553_vm6, %v1548_v5 }
 0xe61   : > { %v1550_v30 = vpop.permute.xlu1 %1549 }
 0xe62   : > { %1555 = vst.msk [vmem:[#allocation3 + $0x8] sm:$0xff] %vm1553_vm6, %v1550_v30 }
 0xe65   : > { %v1761_v22 = vpop.permute.xlu1 %1760 }
 0xe66   : > { %1766 = vst.msk [vmem:[#allocation3 + $0x8] sm:$0xff] %vm1764_vm7, %v1761_v22 }
 0xe67   : > { %v4265_v26 = vpop.eup %4264 }
 0xe68   : > { %v2704_v44 = vsel %vm1233_vm5, %v4265_v26, 0.0 }
 0xe69   : > { %v4267_v23 = vpop.eup %4266  ;;  %v1972_v24 = vpop.permute.xlu1 %1971  ;;  %2705 = vadd.xlane.f32.xlu0 %v2704_v44  ;;  %v5237_v44 = vld [vmem:[%s5420_s24] ss:$0 sm:$0xff] }
 0xe6a   : > { %1977 = vst.msk [vmem:[#allocation3 + $0x8] sm:$0xff] %vm1975_vm8, %v1972_v24  ;;  %v2701_v25 = vsel %vm1233_vm5, %v4267_v23, 0.0  ;;  %v5241_v24 = vld [vmem:[%s5421_s26] ss:$0 sm:$0xff] }
 0xe6d   : > { %v2383_v27 = vpop.permute.xlu1 %2382  ;;  %2702 = vadd.xlane.f32.xlu0 %v2701_v25 }
 0xe6e   : > { %2387 = vst.msk [vmem:[#allocation3 + $0x18] sm:$0xff] %vm1553_vm6, %v2383_v27 }
 0xe71   : > { %v2593_v29 = vpop.permute.xlu1 %2592  ;;  %v2809_v48 = vld [vmem:[#allocation3 + $0x8] sm:$0xff] }
 0xe72   : > { %2597 = vst.msk [vmem:[#allocation3 + $0x18] sm:$0xff] %vm1764_vm7, %v2593_v29  ;;  %v3002_v29 = vld [vmem:[%s4888_s15 + $0x18] sm:$0xff] }
 0xe73   : > { %4045 = vmatprep.subr.mxu1 %v3002_v29 }
 0xe74   : > { %4046 = vmatpush3.msra.mxu1 %v3002_v29 }
 0xe83   : > { %2711 = vrot.lane.b32.xlu0 %v5066_v14, %s4571_s27 }
 0xe87   : > { %1758 = vrot.lane.b32.xlu0 %v5050_v6, %s4573_s22 }
 0xe8b   : > { %1969 = vrot.lane.b32.xlu0 %v5086_v34, %s4574_s20 }
 0xe8f   : > { %2380 = vrot.lane.b32.xlu0 %v5144_v39, %s4572_s11 }
 0xe93   : > { %2590 = vrot.lane.b32.xlu0 %v2579_v12, %s4573_s22 }
 0xef2   : > { %v2706_v31 = vpop.xlane.xlu0 %2705 }
 0xef3   : > { %4268 = vrcp.f32 %v2706_v31  ;;  %v3001_v31 = vld [vmem:[%s4888_s15 + $0x10] sm:$0xff] }
 0xef4   : > { %4047 = vmatprep.subr.mxu1 %v3001_v31 }
 0xef5   : > { %4048 = vmatpush3.msra.mxu1 %v3001_v31 }
 0xef6   : > { %v2703_v32 = vpop.xlane.xlu0 %2702 }
 0xef7   : > { %4270 = vrcp.f32 %v2703_v32  ;;  %v3000_v32 = vld [vmem:[%s4888_s15 + $0x8] sm:$0xff] }
 0xef8   : > { %4049 = vmatprep.subr.mxu1 %v3000_v32 }
 0xef9   : > { %4050 = vmatpush3.msra.mxu1 %v3000_v32 }
 0xefa   : > { %v2712_v33 = vpop.permute.xlu0 %2711 }
 0xefb   : > { %4026 = vmatprep.subr.mxu0 %v2712_v33 }
 0xefc   : > { %4027 = vmatpush3.msra.mxu0 %v2712_v33  ;;  %v2999_v33 = vld [vmem:[%s4888_s15] sm:$0xff]  ;;  %s5422_s15 = scalar_lea.vmem [#allocation10], %s4842_s3 }
 0xefd   : > { %4031 = vmatprep.subr.mxu0 %v2815_v35  ;;  %4051 = vmatprep.subr.mxu1 %v2999_v33 }
 0xefe   : > { %v1759_v6 = vpop.permute.xlu0 %1758  ;;  %4052 = vmatpush3.msra.mxu1 %v2999_v33 }
 0xeff   : > { %1765 = vst.msk [vmem:[#allocation3] sm:$0xff] %vm1764_vm7, %v1759_v6 }
 0xf00   : > { %v4269_v34 = vpop.eup %4268 }
 0xf01   : > { %v2710_v39 = vmul.f32 %v4269_v34, %v4265_v26 }
 0xf02   : > { %v1970_v14 = vpop.permute.xlu0 %1969 }
 0xf03   : > { %1976 = vst.msk [vmem:[#allocation3] sm:$0xff] %vm1975_vm8, %v1970_v14 }
 0xf04   : > { %v4271_v36 = vpop.eup %4270 }
 0xf05   : > { %v2709_v37 = vmul.f32 %v4271_v36, %v4267_v23 }
 0xf06   : > { %v2381_v38 = vpop.permute.xlu0 %2380 }
 0xf07   : > { %2386 = vst.msk [vmem:[#allocation3 + $0x10] sm:$0xff] %vm1553_vm6, %v2381_v38  ;;  %4028 = vmatprep.mubr.msk.f32.mxu0 %vm1233_vm5, %v2709_v37 }
 0xf08   : > { %4029 = vmatmul.mubr.msk.f32.vlgmr.msra.gmra.mxu0 %vm1233_vm5, %v2710_v39 }
 0xf09   : > { %4032 = vmatpush3.msra.mxu0 %v2815_v35 }
 0xf0a   : > { %4033 = vmatprep.subr.mxu0 %v2814_v40  ;;  %v2591_v42 = vpop.permute.xlu0 %2590  ;;  %v2808_v45 = vld [vmem:[#allocation3] sm:$0xff] }
 0xf0b   : > { %4034 = vmatpush3.msra.mxu0 %v2814_v40  ;;  %2596 = vst.msk [vmem:[#allocation3 + $0x10] sm:$0xff] %vm1764_vm7, %v2591_v42  ;;  %4039 = vmatprep.mubr.msk.f32.mxu0 %vm1041_vm2, %v2808_v45 }
 0xf0c   : > { %4035 = vmatprep.subr.mxu0 %v2813_v41 }
 0xf0d   : > { %4036 = vmatpush3.msra.mxu0 %v2813_v41 }
 0xf0e   : > { %4037 = vmatprep.subr.mxu0 %v2812_v47 }
 0xf0f   : > { %4038 = vmatpush3.msra.mxu0 %v2812_v47 }
 0xf10   : > { %4040 = vmatmul.mubr.msk.f32.vlgmr.msra.gmra.mxu0 %vm1041_vm2, %v2809_v48 }
 0xfc8   : > { %v4030_v49 = vpop.f32.mrf.mxu0 }
 0xfc9   : > { %2802 = vrot.lane.b32.xlu1 %v4030_v49, %s4574_s20 }
 0xfca   : > { %v2789_v50 = vpop.f32.mrf.mxu0 }
 0xfcb   : > { %2800 = vrot.lane.b32.xlu0 %v2789_v50, %s4574_s20 }
 0xfd0   : > { %v4041_v51 = vpop.f32.mrf.mxu0 }
 0xfd1   : > { %v2907_v55 = vadd.f32 %v4041_v51, %v3752_v53 }
 0xfd2   : > { %v2901_v52 = vpop.f32.mrf.mxu0 }
 0xfd3   : > { %v2902_v54 = vadd.f32 %v3752_v53, %v2901_v52  ;;  %v2921_v59 = vadd.f32 %v4289_v58, %v2907_v55  ;;  %v3118_v52 = vld [vmem:[%s4898_s28 + $0x38] sm:$0xff]  ;;  %v3115_v55 = vld [vmem:[%s4898_s28 + $0x20] sm:$0xff]  ;;  %v3112_v58 = vld [vmem:[%s4898_s28 + $0x8] sm:$0xff] }
 0xfd4   : > { %4059 = vmatprep.subr.mxu0 %v3118_v52 }
 0xfd5   : > { %v2920_v57 = vadd.f32 %v4288_v56, %v2902_v54  ;;  %v2929_v61 = vsel %vm1041_vm2, %v2921_v59, 0.0  ;;  %4060 = vmatpush3.msra.mxu0 %v3118_v52  ;;  %v3116_v54 = vld [vmem:[%s4898_s28 + $0x28] sm:$0xff]  ;;  %v3114_v56 = vld [vmem:[%s4898_s28 + $0x18] sm:$0xff] }
 0xfd7   : > { %v2926_v60 = vsel %vm1041_vm2, %v2920_v57, 0.0 }
 0xfea   : > { %2927 = vadd.xlane.f32.xlu0 %v2926_v60 }
 0xfed   : > { %2930 = vadd.xlane.f32.xlu1 %v2929_v61 }
0x103b   : > { %v2803_v62 = vpop.permute.xlu1 %2802 }
0x103c   : > { %2807 = vst.msk [vmem:[#allocation3 + $0x18] sm:$0xff] %vm1975_vm8, %v2803_v62 }
0x103d   : > { %v2801_v63 = vpop.permute.xlu0 %2800 }
0x103e   : > { %2806 = vst.msk [vmem:[#allocation3 + $0x10] sm:$0xff] %vm1975_vm8, %v2801_v63 }
0x1043   : > { %v2811_v1 = vld [vmem:[#allocation3 + $0x18] sm:$0xff] }
0x1045   : > { %v2810_v0 = vld [vmem:[#allocation3 + $0x10] sm:$0xff] }
0x1046   : > { %4042 = vmatprep.mubr.msk.f32.mxu0 %vm1041_vm2, %v2810_v0 }
0x1047   : > { %4043 = vmatmul.mubr.msk.f32.gmra.mxu0 %vm1041_vm2, %v2811_v1 }
0x1073   : > { %v2928_v2 = vpop.xlane.xlu0 %2927 }
0x1074   : > { %v2939_v7 = vmul.f32 0.03125, %v2928_v2 }
0x1076   : > { %v2943_v8 = vsub.f32 %v2920_v57, %v2939_v7  ;;  %v2931_v11 = vpop.xlane.xlu1 %2930  ;;  %v3113_v57 = vld [vmem:[%s4898_s28 + $0x10] sm:$0xff] }
0x1077   : > { %v2940_v19 = vmul.f32 0.03125, %v2931_v11 }
0x1078   : > { %v2947_v9 = vmul.f32 %v2943_v8, %v2943_v8 }
0x1079   : > { %v2944_v4 = vsub.f32 %v2921_v59, %v2940_v19  ;;  %v3111_v59 = vld [vmem:[%s4898_s28] sm:$0xff] }
0x107a   : > { %v2951_v10 = vsel %vm1041_vm2, %v2947_v9, 0.0 }
0x107b   : > { %2952 = vadd.xlane.f32.xlu1 %v2951_v10  ;;  %v2948_v30 = vmul.f32 %v2944_v4, %v2944_v4 }
0x107d   : > { %v2954_v26 = vsel %vm1041_vm2, %v2948_v30, 0.0 }
0x1104   : > { %v2953_v12 = vpop.xlane.xlu1 %2952 }
0x1105   : > { %v2963_v15 = vmul.f32 0.03125, %v2953_v12 }
0x1107   : > { %v2967_v16 = vadd.f32 1e-05, %v2963_v15  ;;  %v4044_v17 = vpop.f32.mrf.mxu0 }
0x1108   : > { %v2917_v28 = vadd.f32 %v4044_v17, %v3752_v53 }
0x1109   : > { %4272 = vrsqrt.f32 %v2967_v16  ;;  %v2911_v18 = vpop.f32.mrf.mxu0  ;;  %v3759_v16 = vld [vmem:[%s5422_s15] ss:$0 sm:$0xff]  ;;  %s5427_s15 = sld [smem:[#allocation34_spill]] (!%p3771_p2) }
0x110a   : > { %v2912_v46 = vadd.f32 %v3752_v53, %v2911_v18  ;;  %v2923_v3 = vadd.f32 %v4291_v21, %v2917_v28  ;;  %v3117_v53 = vld [vmem:[%s4898_s28 + $0x30] sm:$0xff]  ;;  %s5423_s28 = scalar_lea.vmem [#allocation12], %s4842_s3 }
0x110b   : > { %4061 = vmatprep.subr.mxu0 %v3117_v53  ;;  %v3764_v30 = vld [vmem:[%s5423_s28] ss:$0 sm:$0xff] }
0x110c   : > { %v2922_v20 = vadd.f32 %v4290_v13, %v2912_v46  ;;  %v2935_v5 = vsel %vm1041_vm2, %v2923_v3, 0.0  ;;  %4062 = vmatpush3.msra.mxu0 %v3117_v53 }
0x110d   : > { %4063 = vmatprep.subr.mxu0 %v3116_v54 }
0x110e   : > { %v2932_v43 = vsel %vm1041_vm2, %v2922_v20, 0.0  ;;  %4064 = vmatpush3.msra.mxu0 %v3116_v54 }
0x110f   : > { %2933 = vadd.xlane.f32.xlu0 %v2932_v43  ;;  %4065 = vmatprep.subr.mxu0 %v3115_v55 }
0x1110   : > { %4066 = vmatpush3.msra.mxu0 %v3115_v55 }
0x1111   : > { %4067 = vmatprep.subr.mxu0 %v3114_v56 }
0x1112   : > { %4068 = vmatpush3.msra.mxu0 %v3114_v56 }
0x1113   : > { %2936 = vadd.xlane.f32.xlu0 %v2935_v5  ;;  %4069 = vmatprep.subr.mxu0 %v3113_v57 }
0x1114   : > { %4070 = vmatpush3.msra.mxu0 %v3113_v57 }
0x1115   : > { %4071 = vmatprep.subr.mxu0 %v3112_v58 }
0x1116   : > { %v4273_v22 = vpop.eup %4272  ;;  %4072 = vmatpush3.msra.mxu0 %v3112_v58 }
0x1117   : > { %2955 = vadd.xlane.f32.xlu0 %v2954_v26  ;;  %v2975_v23 = vmul.f32 %v4273_v22, %v2943_v8  ;;  %4073 = vmatprep.subr.mxu0 %v3111_v59 }
0x1118   : > { %4074 = vmatpush3.msra.mxu0 %v3111_v59 }
0x1119   : > { %v2985_v25 = vmul.f32 %v5237_v44, %v2975_v23 }
0x111b   : > { %v5245_v27 = vadd.f32 %v5241_v24, %v2985_v25 }
0x111d   : > { %4053 = vmatprep.mubr.msk.f32.mxu1 %vm1041_vm2, %v5245_v27 }
0x1198   : > { %v2934_v35 = vpop.xlane.xlu0 %2933 }
0x1199   : > { %v2941_v6 = vmul.f32 0.03125, %v2934_v35 }
0x119b   : > { %v2945_v14 = vsub.f32 %v2922_v20, %v2941_v6 }
0x119c   : > { %v2937_v34 = vpop.xlane.xlu0 %2936 }
0x119d   : > { %v2942_v36 = vmul.f32 0.03125, %v2937_v34  ;;  %v2949_v37 = vmul.f32 %v2945_v14, %v2945_v14 }
0x119f   : > { %v2946_v38 = vsub.f32 %v2923_v3, %v2942_v36  ;;  %v2957_v39 = vsel %vm1041_vm2, %v2949_v37, 0.0 }
0x11a0   : > { %2958 = vadd.xlane.f32.xlu1 %v2957_v39  ;;  %v2956_v40 = vpop.xlane.xlu0 %2955 }
0x11a1   : > { %v2964_v41 = vmul.f32 0.03125, %v2956_v40  ;;  %v2950_v42 = vmul.f32 %v2946_v38, %v2946_v38 }
0x11a3   : > { %v2968_v45 = vadd.f32 1e-05, %v2964_v41  ;;  %v2960_v47 = vsel %vm1041_vm2, %v2950_v42, 0.0 }
0x11a4   : > { %2961 = vadd.xlane.f32.xlu0 %v2960_v47 }
0x11a5   : > { %4274 = vrsqrt.f32 %v2968_v45 }
0x11b2   : > { %v4275_v48 = vpop.eup %4274 }
0x11b3   : > { %v2976_v49 = vmul.f32 %v4275_v48, %v2944_v4 }
0x11b5   : > { %v2986_v50 = vmul.f32 %v5237_v44, %v2976_v49 }
0x11b7   : > { %v5257_v51 = vadd.f32 %v5241_v24, %v2986_v50 }
0x11b9   : > { %4054 = vmatmul.mubr.msk.f32.vlgmr.msra.gmra.mxu1 %vm1041_vm2, %v5257_v51 }
0x1229   : > { %v2959_v60 = vpop.xlane.xlu1 %2958 }
0x122a   : > { %v2965_v61 = vmul.f32 0.03125, %v2959_v60 }
0x122c   : > { %v2969_v62 = vadd.f32 1e-05, %v2965_v61 }
0x122d   : > { %v2962_v63 = vpop.xlane.xlu0 %2961 }
0x122e   : > { %4276 = vrsqrt.f32 %v2969_v62  ;;  %v2966_v0 = vmul.f32 0.03125, %v2962_v63 }
0x1230   : > { %v2970_v1 = vadd.f32 1e-05, %v2966_v0 }
0x1232   : > { %4278 = vrsqrt.f32 %v2970_v1 }
0x123b   : > { %v4277_v2 = vpop.eup %4276 }
0x123c   : > { %v2977_v7 = vmul.f32 %v4277_v2, %v2945_v14 }
0x123e   : > { %v2987_v8 = vmul.f32 %v5237_v44, %v2977_v7  ;;  %v3769_v7 = vld [vmem:[%s5424_s29] ss:$0 sm:$0xff] }
0x123f   : > { %v4279_v9 = vpop.eup %4278 }
0x1240   : > { %v2997_v10 = vadd.f32 %v5241_v24, %v2987_v8  ;;  %v2978_v11 = vmul.f32 %v4279_v9, %v2946_v38 }
0x1242   : > { %4056 = vmatprep.mubr.msk.f32.mxu1 %vm1041_vm2, %v2997_v10  ;;  %v2988_v12 = vmul.f32 %v5237_v44, %v2978_v11 }
0x1244   : > { %v2998_v15 = vadd.f32 %v5241_v24, %v2988_v12 }
0x1246   : > { %4057 = vmatmul.mubr.msk.f32.gmra.mxu1 %vm1041_vm2, %v2998_v15 }
0x1279   : > { %v4055_v17 = vpop.f32.mrf.mxu1 }
0x127a   : > { %v3094_v18 = vadd.f32 %v4055_v17, %v3759_v16 }
0x127b   : > { %v3088_v19 = vpop.f32.mrf.mxu1 }
0x127c   : > { %v3089_v28 = vadd.f32 %v3759_v16, %v3088_v19  ;;  %v3108_v13 = vmax.f32 %v3094_v18, 0.0 }
0x127e   : > { %v3107_v46 = vmax.f32 %v3089_v28, 0.0 }
0x1280   : > { %4075 = vmatprep.mubr.msk.f32.mxu0 %vm3126_vm9, %v3107_v46 }
0x1281   : > { %4076 = vmatmul.mubr.msk.f32.vlgmr.msra.gmra.mxu0 %vm3126_vm9, %v3108_v13 }
0x1306   : > { %v4058_v20 = vpop.f32.mrf.mxu1 }
0x1307   : > { %v3104_v4 = vadd.f32 %v4058_v20, %v3759_v16 }
0x1308   : > { %v3098_v43 = vpop.f32.mrf.mxu1 }
0x1309   : > { %v3099_v21 = vadd.f32 %v3759_v16, %v3098_v43  ;;  %v3110_v5 = vmax.f32 %v3104_v4, 0.0 }
0x130b   : > { %v3109_v3 = vmax.f32 %v3099_v21, 0.0 }
0x130d   : > { %4078 = vmatprep.mubr.msk.f32.mxu0 %vm3126_vm9, %v3109_v3 }
0x130e   : > { %4079 = vmatmul.mubr.msk.f32.gmra.mxu0 %vm3126_vm9, %v3110_v5 }
0x1341   : > { %v4077_v22 = vpop.f32.mrf.mxu0 }
0x1342   : > { %v3211_v26 = vadd.f32 %v4077_v22, %v3764_v30 }
0x1343   : > { %v3205_v44 = vpop.f32.mrf.mxu0 }
0x1344   : > { %v3225_v23 = vadd.f32 %v3211_v26, %v5257_v51  ;;  %v3206_v24 = vadd.f32 %v3764_v30, %v3205_v44 }
0x1346   : > { %v3233_v25 = vsel %vm1041_vm2, %v3225_v23, 0.0  ;;  %v3224_v29 = vadd.f32 %v3206_v24, %v5245_v27 }
0x1347   : > { %3234 = vadd.xlane.f32.xlu0 %v3233_v25 }
0x1348   : > { %v3230_v31 = vsel %vm1041_vm2, %v3224_v29, 0.0 }
0x1349   : > { %3231 = vadd.xlane.f32.xlu1 %v3230_v31 }
0x13ce   : > { %v4080_v32 = vpop.f32.mrf.mxu0 }
0x13cf   : > { %v3221_v33 = vadd.f32 %v4080_v32, %v3764_v30 }
0x13d0   : > { %v3215_v35 = vpop.f32.mrf.mxu0  ;;  %v3235_v6 = vpop.xlane.xlu0 %3234 }
0x13d1   : > { %v3227_v14 = vadd.f32 %v3221_v33, %v2998_v15  ;;  %v3216_v34 = vadd.f32 %v3764_v30, %v3215_v35  ;;  %v3243_v36 = vmul.f32 0.03125, %v3235_v6 }
0x13d2   : > { %v3232_v37 = vpop.xlane.xlu1 %3231 }
0x13d3   : > { %v3247_v38 = vsub.f32 %v3225_v23, %v3243_v36  ;;  %v3242_v39 = vmul.f32 0.03125, %v3232_v37  ;;  %v3239_v40 = vsel %vm1041_vm2, %v3227_v14, 0.0  ;;  %v3226_v41 = vadd.f32 %v3216_v34, %v2997_v10  ;;  %v3770_v10 = vld [vmem:[%s908_s25] ss:$0 sm:$0xff]  ;;  %s5425_s25 = sld [smem:[#allocation35_spill]] (!%p3771_p2) }
0x13d4   : > { %3240 = vadd.xlane.f32.xlu0 %v3239_v40 }
0x13d5   : > { %v3246_v42 = vsub.f32 %v3224_v29, %v3242_v39  ;;  %v3236_v27 = vsel %vm1041_vm2, %v3226_v41, 0.0  ;;  %v3251_v45 = vmul.f32 %v3247_v38, %v3247_v38 }
0x13d6   : > { %3237 = vadd.xlane.f32.xlu1 %v3236_v27 }
0x13d7   : > { %v3257_v47 = vsel %vm1041_vm2, %v3251_v45, 0.0  ;;  %v3250_v48 = vmul.f32 %v3246_v42, %v3246_v42 }
0x13d8   : > { %3258 = vadd.xlane.f32.xlu0 %v3257_v47 }
0x13d9   : > { %v3254_v49 = vsel %vm1041_vm2, %v3250_v48, 0.0 }
0x13da   : > { %3255 = vadd.xlane.f32.xlu1 %v3254_v49 }
0x145d   : > { %v3241_v50 = vpop.xlane.xlu0 %3240 }
0x145e   : > { %v3245_v51 = vmul.f32 0.03125, %v3241_v50 }
0x145f   : > { %v3238_v52 = vpop.xlane.xlu1 %3237 }
0x1460   : > { %v3249_v53 = vsub.f32 %v3227_v14, %v3245_v51  ;;  %v3244_v54 = vmul.f32 0.03125, %v3238_v52 }
0x1461   : > { %v3259_v55 = vpop.xlane.xlu0 %3258 }
0x1462   : > { %v3248_v56 = vsub.f32 %v3226_v41, %v3244_v54  ;;  %v3267_v57 = vmul.f32 0.03125, %v3259_v55  ;;  %v3253_v58 = vmul.f32 %v3249_v53, %v3249_v53 }
0x1463   : > { %v3256_v59 = vpop.xlane.xlu1 %3255 }
0x1464   : > { %v3271_v60 = vadd.f32 1e-05, %v3267_v57  ;;  %v3266_v61 = vmul.f32 0.03125, %v3256_v59  ;;  %v3263_v62 = vsel %vm1041_vm2, %v3253_v58, 0.0  ;;  %v3252_v63 = vmul.f32 %v3248_v56, %v3248_v56 }
0x1465   : > { %3264 = vadd.xlane.f32.xlu0 %v3263_v62 }
0x1466   : > { %4280 = vrsqrt.f32 %v3271_v60  ;;  %v3270_v0 = vadd.f32 1e-05, %v3266_v61  ;;  %v3260_v1 = vsel %vm1041_vm2, %v3252_v63, 0.0 }
0x1467   : > { %3261 = vadd.xlane.f32.xlu1 %v3260_v1 }
0x1468   : > { %4282 = vrsqrt.f32 %v3270_v0 }
0x1473   : > { %v4281_v2 = vpop.eup %4280 }
0x1474   : > { %v3279_v8 = vmul.f32 %v4281_v2, %v3247_v38 }
0x1475   : > { %v4283_v9 = vpop.eup %4282 }
0x1476   : > { %v3289_v11 = vmul.f32 %v3769_v7, %v3279_v8  ;;  %v3278_v12 = vmul.f32 %v4283_v9, %v3246_v42 }
0x1478   : > { %v3299_v15 = vadd.f32 %v3770_v10, %v3289_v11  ;;  %v3288_v16 = vmul.f32 %v3769_v7, %v3278_v12 }
0x147a   : > { %3303 = vst.msk [vmem:[#allocation2 + $0x8] sm:$0xff] %vm1041_vm2, %v3299_v15  ;;  %v3298_v17 = vadd.f32 %v3770_v10, %v3288_v16 }
0x147c   : > { %3302 = vst.msk [vmem:[#allocation2] sm:$0xff] %vm1041_vm2, %v3298_v17 }
0x14ee   : > { %v3265_v18 = vpop.xlane.xlu0 %3264 }
0x14ef   : > { %v3269_v19 = vmul.f32 0.03125, %v3265_v18 }
0x14f0   : > { %v3262_v28 = vpop.xlane.xlu1 %3261 }
0x14f1   : > { %v3273_v46 = vadd.f32 1e-05, %v3269_v19  ;;  %v3268_v13 = vmul.f32 0.03125, %v3262_v28 }
0x14f3   : > { %4284 = vrsqrt.f32 %v3273_v46  ;;  %v3272_v20 = vadd.f32 1e-05, %v3268_v13 }
0x14f5   : > { %4286 = vrsqrt.f32 %v3272_v20 }
0x1500   : > { %v4285_v4 = vpop.eup %4284 }
0x1501   : > { %v3281_v43 = vmul.f32 %v4285_v4, %v3249_v53 }
0x1502   : > { %v4287_v21 = vpop.eup %4286 }
0x1503   : > { %v3291_v3 = vmul.f32 %v3769_v7, %v3281_v43  ;;  %v3280_v5 = vmul.f32 %v4287_v21, %v3248_v56 }
0x1505   : > { %v3301_v30 = vadd.f32 %v3770_v10, %v3291_v3  ;;  %v3290_v22 = vmul.f32 %v3769_v7, %v3280_v5  ;;  %3309 = sbr.rel (%p3771_p2) target bundleno = 5893 (0x1705), region = 128 }
0x1507   : > { %3305 = vst.msk [vmem:[#allocation2 + $0x18] sm:$0xff] %vm1041_vm2, %v3301_v30  ;;  %v3300_v26 = vadd.f32 %v3770_v10, %v3290_v22 }
0x1509   : > { %3304 = vst.msk [vmem:[#allocation2 + $0x10] sm:$0xff] %vm1041_vm2, %v3300_v26 }
0x150a   : > { %v3311_v44 = vrot.slane %v3300_v26, 7  ;;  %vm3313_vm10 = vcmask 1040384   ;;  %vm3317_vm11 = vcmask 254976   ;;  %v3348_v35 = vld [vmem:[%s5425_s25 + $0x18] sm:$0xff]  ;;  %v4575_v6 = vmov 0.0   ;;  %v3347_v14 = vld [vmem:[%s5425_s25 + $0x10] sm:$0xff] }
0x150b   : > { %4081 = vmatprep.subr.mxu0 %v4575_v6  ;;  %vm4576_vm12 = vmmov 0   ;;  %v3346_v34 = vld [vmem:[%s5425_s25 + $0x8] sm:$0xff]  ;;  %v3345_v36 = vld [vmem:[%s5425_s25] sm:$0xff]  ;;  %vm3429_vm13 = vcmask 156672  }
0x150c   : > { %v3314_v23 = vsel %vm3313_vm10, %v3298_v17, %v3311_v44  ;;  %4089 = vmatprep.mubr.msk.f32.mxu0 %vm4576_vm12, %v4575_v6  ;;  %4082 = vmatpush3.msra.mxu0 %v3348_v35  ;;  %v3772_v41 = vld [vmem:[%s5426_s16] ss:$0 sm:$0xff] }
0x150d   : > { %v3318_v24 = vsel %vm3317_vm11, %v3314_v23, 0.0  ;;  %4083 = vmatprep.subr.mxu0 %v4575_v6  ;;  %v3773_v27 = vld [vmem:[%s5427_s15] ss:$0 sm:$0xff] }
0x150e   : > { %3319 = vadd.xlane.f32.xlu0 %v3318_v24  ;;  %4084 = vmatpush3.msra.mxu0 %v3347_v14  ;;  %v3774_v48 = vld [vmem:[%s5428_s0] ss:$0 sm:$0xff] }
0x150f   : > { %4085 = vmatprep.subr.mxu0 %v4575_v6 }
0x1510   : > { %4086 = vmatpush3.msra.mxu0 %v3346_v34 }
0x1511   : > { %4087 = vmatprep.subr.mxu0 %v4575_v6 }
0x1512   : > { %4088 = vmatpush3.msra.mxu0 %v3345_v36 }
0x1597   : > { %v3320_v25 = vpop.xlane.xlu0 %3319 }
0x1598   : > { %v3321_v29 = vmul.f32 0.03125, %v3320_v25 }
0x159a   : > { %v3322_v31 = vsub.f32 %v3314_v23, %v3321_v29 }
0x159c   : > { %v3323_v32 = vmul.f32 %v3322_v31, %v3322_v31 }
0x159e   : > { %v3324_v33 = vsel %vm3317_vm11, %v3323_v32, 0.0 }
0x159f   : > { %3325 = vadd.xlane.f32.xlu0 %v3324_v33 }
0x1628   : > { %v3326_v37 = vpop.xlane.xlu0 %3325 }
0x1629   : > { %v3327_v38 = vmul.f32 0.03125, %v3326_v37 }
0x162b   : > { %v3328_v39 = vadd.f32 1e-05, %v3327_v38 }
0x162d   : > { %4292 = vrsqrt.f32 %v3328_v39 }
0x163a   : > { %v4293_v40 = vpop.eup %4292 }
0x163b   : > { %v3330_v42 = vmul.f32 %v4293_v40, %v3322_v31 }
0x163d   : > { %v3337_v45 = vmul.f32 %v3772_v41, %v3330_v42 }
0x163f   : > { %v3344_v47 = vadd.f32 %v3773_v27, %v3337_v45 }
0x1641   : > { %4090 = vmatmul.mubr.msk.f32.vlgmr.msra.gmra.mxu0 %vm1041_vm2, %v3344_v47 }
0x1701   : > { %v3425_v49 = vpop.f32.mrf.mxu0 }
0x1702   : > { %v3426_v50 = vadd.f32 %v3774_v48, %v3425_v49 }
0x1703   : > { %v4091_v51 = vpop.f32.mrf.mxu0 }
0x1704   : > { %3430 = vst.msk [vmem:[#allocation15] sm:$0x3] %vm3429_vm13, %v3426_v50 }
0x1705 PF: > { %p4137_p4 = scmp.eq.s32.totalorder %s4767_s7, 1  ;;  %s4577_s19 = smov [#allocation15]  }
0x1706   : > { %s3440_s3 = sshll.u32 %s4577_s19, 4  ;;  %s3441_s3 = int_to_ptr.vmem [resolvable:$true] %s3440_s3 }
0x1707   : > { %s4460_s18 = scalar_lea.vmem %s3441_s3, 32  ;;  %p4467_p10 = scmp.lt.s32.totalorder %s3441_s3, %s3441_s3 }
0x1708   : > { %p4461_p5 = scmp.ne.s32.totalorder %s3441_s3, %s4460_s18  ;;  %p4468_p11 = scmp.lt.s32.totalorder %s4460_s18, %s4460_s18 }
0x170a   : > { %p4462_p8 = pnand %p4461_p5, %p4137_p4  ;;  %p4469_p0 = por %p4468_p11, %p4467_p10 }
0x170c   : > { %p4463_p9 = pneg %p4462_p8 }
0x170e   : > { %p4470_p3 = pnand %p4469_p0, %p4463_p9 }
0x1710   : > { %4473 = shalt.err (!%p4470_p3)
}
0x1711   : > { %s5429_s1 = sld [smem:[#allocation37_spill]] }
0x1717   : > { %4111 = dma.vmem_to_hbm [thread:$0]  (%p4137_p4), %s3441_s3, 32, %s5429_s1, [#allocation6]  }
0x1718   : > { %4525 = dma.done.wait (%p4137_p4), [#allocation6], 32  }
0x1719   : > { %4527 = vsyncadd (%p4137_p4), [#allocation6], 4294967264 }
0x171a PF: > { %s5430_s27 = sld [smem:[#allocation23_spill]]  ;;  %s5435_s0 = smov %s4534_s30 }
0x171b   : > { %s5431_s11 = sld [smem:[#allocation21_spill]] }
0x171c   : > { %s5432_s20 = sld [smem:[#allocation25_spill]] }
0x171d   : > { %s5433_s21 = sld [smem:[#allocation22_spill]] }
0x171e   : > { %s5434_s1 = sld [smem:[#allocation24_spill]] }
0x1720   : > { %s40_s22 = sadd.s32 1, %s5430_s27  }
0x1721   : > { %p37_p12 = scmp.ge.s32.totalorder %s40_s22, 4   ;;  %s5436_s30 = smov %s5431_s11 }
0x1723   :  { %39 = sbr.rel (!%p37_p12) target bundleno = 23 (0x17), region = 219 }
0x1728   :  { %3453 = vsyncpa [#allocation5], 1 }
0x1729   :  { %3455 = vsyncpa [#allocation5 + $0x1], 1 }
0x172a   :  { %3456 = vsyncpa [#allocation8], 1 }
0x172b   :  { %3458 = vsyncpa [#allocation8 + $0x1], 1 }
0x172c   :  { %3459 = vsyncpa [#allocation11], 1 }
0x172d   :  { %3461 = vsyncpa [#allocation11 + $0x1], 1 }
0x172e   :  { %3462 = vsyncpa [#allocation14], 1 }
0x172f   :  { %3464 = vsyncpa [#allocation14 + $0x1], 1 }
0x1730   :  { %3465 = vsyncpa [#allocation6], 1 }
0x1731   :  { %3467 = vsyncpa [#allocation6 + $0x1], 1 }

</bundles_post_ra>
